<compile_context>
chip_gen: v5e
topology: v5e:2x2
jax: 0.10.0
libtpu: 0.0.40
codegen_flags: <defaults>
</compile_context>

<pallas_src>
import functools
import math

import jax
import jax.numpy as jnp
from jax import lax
from jax.experimental import pallas as pl
from jax.experimental.pallas import tpu as pltpu


# ---------------------------------------------------------------------------
# VMEM budgeting helpers
# ---------------------------------------------------------------------------
def _vmem_limit_bytes():
    """Scoped-VMEM limit: 3/4 of physical, capped at 96 MiB (safe on v5e/v6e/v7x)."""
    try:
        cap = pltpu.get_tpu_info().vmem_capacity_bytes
        return int(min(96 * 1024 * 1024, (cap * 3) // 4))
    except Exception:
        return None  # keep the compiler default


def _pick_tq(S, n_heads, d_k, d_v, d_model, d_ff, vmem_budget):
    """Largest query tile whose working set fits the scoped-VMEM budget.

    The fixed (TQ-independent) footprint -- double-buffered bf16 weights, the bf16
    full-sequence KV source block and the persistent K/V caches -- is subtracted
    before budgeting the per-row terms.  TQ is floored at 128 so the MXU M
    dimension stays busy (per the perf review: never shrink below ~128)."""
    if S % 8 != 0 or S <= 128:
        return S
    if vmem_budget is None:
        vmem_budget = 32 * 1024 * 1024

    w_elems = (2 * d_model * n_heads * d_k      # W_Q, W_K
               + d_model * n_heads * d_v        # W_V
               + n_heads * d_v * d_model        # W_fc
               + d_model * d_ff + d_ff * d_ff + d_ff * d_model)   # FFN
    fixed = (2 * 2 * w_elems                    # double-buffered bf16 weights
             + 2 * 2 * S * d_model              # double-buffered bf16 x_kv block
             + 2 * S * n_heads * (d_k + d_v)    # persistent K/V caches (bf16, single)
             + (256 << 10))                     # gammas/betas + headroom
    avail = max(vmem_budget - fixed, 1 << 20)

    # Per-query-row bytes: double-buffered IO blocks + in-kernel f32 temporaries.
    per_row = (2 * 4 * (n_heads * S + 2 * d_model)                        # attn / x_q / out blocks
               + 4 * (n_heads * S + 2 * d_ff + 4 * d_model + n_heads * d_k))
    cap = max(128, min(S, 512, avail // max(per_row, 1)))

    step = 128 if S % 128 == 0 else 8
    tq = (cap // step) * step
    while tq >= step and S % tq:
        tq -= step
    return tq if tq >= step else S


# ---------------------------------------------------------------------------
# Kernel
# ---------------------------------------------------------------------------
def _encoder_layer_kernel(xkv_ref, xq_ref,
                          wq_ref, wk_ref, wv_ref, wfc_ref, g1_ref, b1_ref,
                          w1_ref, w2_ref, w3_ref, g2_ref, b2_ref,
                          out_ref, attn_ref,
                          k_cache, v_cache,
                          *, n_heads, d_k, d_v, eps):
    f32 = jnp.float32
    bf16 = jnp.bfloat16

    # --- K/V projection: once per batch row (qi == 0), cached in persistent VMEM ---
    @pl.when(pl.program_id(1) == 0)
    def _():
        x_kv = xkv_ref[0]                                               # (S, d_model) bf16
        k_cache[...] = jnp.dot(x_kv, wk_ref[...],
                               preferred_element_type=f32).astype(bf16)  # (S, H*dk)
        v_cache[...] = jnp.dot(x_kv, wv_ref[...],
                               preferred_element_type=f32).astype(bf16)  # (S, H*dv)

    x_q_f32 = xq_ref[0]                                                 # (TQ, d_model) f32 residual
    x_q = x_q_f32.astype(bf16)

    # Fused full-width query projection (1/sqrt(d_k) pre-folded into wq_ref).
    q_all = jnp.dot(x_q, wq_ref[...], preferred_element_type=f32).astype(bf16)   # (TQ, H*dk)

    # Per-head attention; the output projection is accumulated over heads into a
    # (TQ, d_model) f32 value -> no ctx scratch, no masked sub-128-lane stores.
    attn_out = x_q_f32                                                  # start from the residual
    contract_last = (((1,), (1,)), ((), ()))                            # contract last dims
    for h in range(n_heads):                                            # static unroll, H small
        q_h = q_all[:, h * d_k:(h + 1) * d_k]
        k_h = k_cache[:, h * d_k:(h + 1) * d_k]
        v_h = v_cache[:, h * d_v:(h + 1) * d_v]

        # TODO(synk): if lowered MLIR shows a vxpose for this dot_general, cache K transposed.
        scores = lax.dot_general(q_h, k_h, contract_last,
                                 preferred_element_type=f32)            # (TQ, S)
        m = jnp.max(scores, axis=-1, keepdims=True)
        p = jnp.exp(scores - m)
        inv_den = pl.reciprocal(jnp.sum(p, axis=-1, keepdims=True), approx=True)
        attn = p * inv_den                                              # (TQ, S) f32

        attn_ref[0, h] = attn                                           # lane-dense (S-wide) store
        ctx_h = jnp.dot(attn.astype(bf16), v_h,
                        preferred_element_type=f32).astype(bf16)        # (TQ, d_v)
        attn_out = attn_out + jnp.dot(ctx_h, wfc_ref[h * d_v:(h + 1) * d_v, :],
                                      preferred_element_type=f32)       # (TQ, d_model)

    def layer_norm(x, g, b):
        # Matches the reference LayerNorm: unbiased std (d-1), eps added to the std
        # (not the variance), exact division (no approx reciprocal).
        d = x.shape[-1]
        mean = jnp.mean(x, axis=-1, keepdims=True)
        var = jnp.sum((x - mean) ** 2, axis=-1, keepdims=True) * (1.0 / (d - 1))
        return g * (x - mean) / (jnp.sqrt(var) + eps) + b

    y1 = layer_norm(attn_out, g1_ref[...], b1_ref[...])                 # (TQ, d_model)

    # Position-wise FFN (Linear-ReLU-Linear-ReLU-Linear) + residual + LayerNorm.
    h1 = jnp.maximum(jnp.dot(y1.astype(bf16), w1_ref[...], preferred_element_type=f32), 0.0)
    h2 = jnp.maximum(jnp.dot(h1.astype(bf16), w2_ref[...], preferred_element_type=f32), 0.0)
    ffn = jnp.dot(h2.astype(bf16), w3_ref[...], preferred_element_type=f32)
    y2 = layer_norm(ffn + y1, g2_ref[...], b2_ref[...])

    out_ref[0] = y2


# ---------------------------------------------------------------------------
# Wrapper
# ---------------------------------------------------------------------------
def encoder_layer(enc_inputs, enc_self_attn_mask, params, *, n_heads, d_k, d_v, tq=None):
    """params = (W_Q, W_K, W_V, W_fc, gamma1, beta1, W1, W2, W3, gamma2, beta2)
    in PyTorch (out_features, in_features) layout.  The mask is accepted for API parity
    but ignored: MultiHeadAttention never forwards it to ScaledDotProductAttention."""
    del enc_self_attn_mask
    B, S, d_model = enc_inputs.shape
    W_Q, W_K, W_V, W_fc, g1, b1, W1, W2, W3, g2, b2 = params
    d_ff = W1.shape[0]
    eps = 1e-6

    vmem_limit = _vmem_limit_bytes()
    if tq is None:
        tq = _pick_tq(S, n_heads, d_k, d_v, d_model, d_ff, vmem_limit)
    assert S % tq == 0 and (tq % 8 == 0 or tq == S), f"bad query tile {tq} for S={S}"
    n_q = S // tq

    bf16 = jnp.bfloat16
    f32 = jnp.float32
    # Host-side layout plumbing: pre-transpose, fold 1/sqrt(d_k) into W_Q, cast to bf16.
    wqT = (W_Q.T * (1.0 / math.sqrt(d_k))).astype(bf16)   # (d_model, H*d_k)
    wkT = W_K.T.astype(bf16)                               # (d_model, H*d_k)
    wvT = W_V.T.astype(bf16)                               # (d_model, H*d_v)
    wfcT = W_fc.T.astype(bf16)                             # (H*d_v, d_model)
    w1T = W1.T.astype(bf16)                                # (d_model, d_ff)
    w2T = W2.T.astype(bf16)                                # (d_ff, d_ff)
    w3T = W3.T.astype(bf16)                                # (d_ff, d_model)
    g1v = g1.reshape(1, d_model).astype(f32)
    b1v = b1.reshape(1, d_model).astype(f32)
    g2v = g2.reshape(1, d_model).astype(f32)
    b2v = b2.reshape(1, d_model).astype(f32)

    # Streamed K/V source in bf16: halves DMA + double-buffered VMEM, numerically identical
    # since the kernel only ever uses it as a bf16 MXU operand.
    x_kv_bf16 = enc_inputs.astype(bf16)

    kernel = functools.partial(_encoder_layer_kernel, n_heads=n_heads,
                               d_k=d_k, d_v=d_v, eps=eps)

    full_seq_spec = pl.BlockSpec((1, S, d_model), lambda b, qi: (b, 0, 0))
    q_tile_spec = pl.BlockSpec((1, tq, d_model), lambda b, qi: (b, qi, 0))

    def w_spec(shape):
        return pl.BlockSpec(shape, lambda b, qi: (0, 0))

    out_shape = (
        jax.ShapeDtypeStruct((B, S, d_model), f32),          # encoder output
        jax.ShapeDtypeStruct((B, n_heads, S, S), f32),       # attention probabilities
    )

    # qi must be sequential so the per-batch K/V caches persist across query tiles;
    # b stays parallel for megacore sharding (v7x).
    cp_kwargs = dict(dimension_semantics=("parallel", "arbitrary"))
    if vmem_limit is not None:
        cp_kwargs["vmem_limit_bytes"] = vmem_limit

    y, attn = pl.pallas_call(
        kernel,
        out_shape=out_shape,
        grid_spec=pltpu.PrefetchScalarGridSpec(
            num_scalar_prefetch=0,
            grid=(B, n_q),
            in_specs=[
                full_seq_spec,                              # x_kv (bf16, full sequence)
                q_tile_spec,                                # x_q  (f32 query tile / residual)
                w_spec((d_model, n_heads * d_k)),           # W_Q^T (pre-scaled)
                w_spec((d_model, n_heads * d_k)),           # W_K^T
                w_spec((d_model, n_heads * d_v)),           # W_V^T
                w_spec((n_heads * d_v, d_model)),           # W_fc^T
                w_spec((1, d_model)), w_spec((1, d_model)), # gamma1, beta1
                w_spec((d_model, d_ff)),                    # W1^T
                w_spec((d_ff, d_ff)),                       # W2^T
                w_spec((d_ff, d_model)),                    # W3^T
                w_spec((1, d_model)), w_spec((1, d_model)), # gamma2, beta2
            ],
            out_specs=[
                pl.BlockSpec((1, tq, d_model), lambda b, qi: (b, qi, 0)),
                pl.BlockSpec((1, n_heads, tq, S), lambda b, qi: (b, 0, qi, 0)),
            ],
            scratch_shapes=[
                pltpu.VMEM((S, n_heads * d_k), bf16),       # persistent K cache (per batch row)
                pltpu.VMEM((S, n_heads * d_v), bf16),       # persistent V cache (per batch row)
            ],
        ),
        compiler_params=pltpu.CompilerParams(**cp_kwargs),
    )(x_kv_bf16, enc_inputs, wqT, wkT, wvT, wfcT, g1v, b1v, w1T, w2T, w3T, g2v, b2v)
    return y, attn


# ---------------------------------------------------------------------------
# Plain-JAX reference mirroring the PyTorch EncoderLayer forward (f32)
# ---------------------------------------------------------------------------
def _reference(enc_inputs, params, *, n_heads, d_k, d_v):
    W_Q, W_K, W_V, W_fc, g1, b1, W1, W2, W3, g2, b2 = params
    B, S, d_model = enc_inputs.shape

    def layer_norm(x, g, b, eps=1e-6):
        mean = x.mean(-1, keepdims=True)
        var = jnp.sum((x - mean) ** 2, -1, keepdims=True) / (x.shape[-1] - 1)
        return g * (x - mean) / (jnp.sqrt(var) + eps) + b

    def proj(x, w, d):
        return (x @ w.T).reshape(B, S, n_heads, d).transpose(0, 2, 1, 3)

    Q = proj(enc_inputs, W_Q, d_k)
    K = proj(enc_inputs, W_K, d_k)
    V = proj(enc_inputs, W_V, d_v)
    scores = jnp.einsum("bhqd,bhkd->bhqk", Q, K) / jnp.sqrt(jnp.float32(d_k))
    attn = jax.nn.softmax(scores, axis=-1)
    ctx = jnp.einsum("bhqk,bhkd->bhqd", attn, V)
    ctx = ctx.transpose(0, 2, 1, 3).reshape(B, S, n_heads * d_v)
    y1 = layer_norm(ctx @ W_fc.T + enc_inputs, g1, b1)
    h1 = jax.nn.relu(y1 @ W1.T)
    h2 = jax.nn.relu(h1 @ W2.T)
    y2 = layer_norm(h2 @ W3.T + y1, g2, b2)
    return y2, attn


# ---------------------------------------------------------------------------
# Self-test
# ---------------------------------------------------------------------------
if __name__ == "__main__":
    def run_case(B, S, d_model, n_heads, d_k, d_v, d_ff, tq):
        key = jax.random.PRNGKey(0)
        keys = jax.random.split(key, 8)
        x = jax.random.normal(keys[0], (B, S, d_model), jnp.float32)

        sm, sf, sv = 1.0 / math.sqrt(d_model), 1.0 / math.sqrt(d_ff), 1.0 / math.sqrt(n_heads * d_v)
        W_Q = jax.random.normal(keys[1], (n_heads * d_k, d_model), jnp.float32) * sm
        W_K = jax.random.normal(keys[2], (n_heads * d_k, d_model), jnp.float32) * sm
        W_V = jax.random.normal(keys[3], (n_heads * d_v, d_model), jnp.float32) * sm
        W_fc = jax.random.normal(keys[4], (d_model, n_heads * d_v), jnp.float32) * sv
        W1 = jax.random.normal(keys[5], (d_ff, d_model), jnp.float32) * sm
        W2 = jax.random.normal(keys[6], (d_ff, d_ff), jnp.float32) * sf
        W3 = jax.random.normal(keys[7], (d_model, d_ff), jnp.float32) * sf
        g1 = jnp.ones((d_model,), jnp.float32)
        b1 = jnp.zeros((d_model,), jnp.float32)
        g2 = jnp.ones((d_model,), jnp.float32)
        b2 = jnp.zeros((d_model,), jnp.float32)
        params = (W_Q, W_K, W_V, W_fc, g1, b1, W1, W2, W3, g2, b2)

        y, attn = encoder_layer(x, None, params, n_heads=n_heads, d_k=d_k, d_v=d_v, tq=tq)
        jax.block_until_ready((y, attn))

        y_ref, attn_r = _reference(x, params, n_heads=n_heads, d_k=d_k, d_v=d_v)
        # bf16 MXU matmuls vs f32 reference (outputs are LN-normalized -> O(1) magnitude).
        attn_err = float(jnp.max(jnp.abs(attn - attn_r)))
        y_err = float(jnp.max(jnp.abs(y - y_ref)))
        y_mean_err = float(jnp.mean(jnp.abs(y - y_ref)))
        assert attn_err < 3e-2, f"attn mismatch: max abs err {attn_err}"
        assert y_err < 1e-1, f"output mismatch: max abs err {y_err}"
        assert y_mean_err < 2e-2, f"output mismatch: mean abs err {y_mean_err}"

    # Small shapes consistent with the module.
    run_case(B=2, S=8, d_model=32, n_heads=4, d_k=8, d_v=8, d_ff=64, tq=None)
    # Larger case exercising the query-tile axis (grid=(2, 2)) and the K/V caching path.
    run_case(B=2, S=256, d_model=128, n_heads=4, d_k=32, d_v=32, d_ff=256, tq=128)

    print("KERNEL_OK")
</pallas_src>

<mosaic_0001>
module attributes {stable_mosaic.version = 11 : i64} {
  func.func @_encoder_layer_kernel(%arg0: i32, %arg1: i32, %arg2: memref<1x8x32xbf16, #tpu.memory_space<vmem>>, %arg3: memref<1x8x32xf32, #tpu.memory_space<vmem>>, %arg4: memref<32x32xbf16, #tpu.memory_space<vmem>>, %arg5: memref<32x32xbf16, #tpu.memory_space<vmem>>, %arg6: memref<32x32xbf16, #tpu.memory_space<vmem>>, %arg7: memref<32x32xbf16, #tpu.memory_space<vmem>>, %arg8: memref<1x32xf32, #tpu.memory_space<vmem>>, %arg9: memref<1x32xf32, #tpu.memory_space<vmem>>, %arg10: memref<32x64xbf16, #tpu.memory_space<vmem>>, %arg11: memref<64x64xbf16, #tpu.memory_space<vmem>>, %arg12: memref<64x32xbf16, #tpu.memory_space<vmem>>, %arg13: memref<1x32xf32, #tpu.memory_space<vmem>>, %arg14: memref<1x32xf32, #tpu.memory_space<vmem>>, %arg15: memref<1x8x32xf32, #tpu.memory_space<vmem>>, %arg16: memref<1x4x8x8xf32, #tpu.memory_space<vmem>>, %arg17: memref<8x32xbf16, #tpu.memory_space<vmem>>, %arg18: memref<8x32xbf16, #tpu.memory_space<vmem>>) attributes {dimension_semantics = [#tpu.dimension_semantics<parallel>, #tpu.dimension_semantics<arbitrary>], iteration_bounds = array<i64: 2, 1>, scalar_prefetch = 0 : i64, scratch_operands = 2 : i64, tpu.core_type = #tpu.core_type<tc>, window_params = [{transform_indices = @transform_0, window_bounds = array<i64: 1, 8, 32>}, {transform_indices = @transform_1, window_bounds = array<i64: 1, 8, 32>}, {pipeline_mode = #tpu.pipeline_mode<synchronous>, transform_indices = @transform_2, window_bounds = array<i64: 32, 32>}, {pipeline_mode = #tpu.pipeline_mode<synchronous>, transform_indices = @transform_3, window_bounds = array<i64: 32, 32>}, {pipeline_mode = #tpu.pipeline_mode<synchronous>, transform_indices = @transform_4, window_bounds = array<i64: 32, 32>}, {pipeline_mode = #tpu.pipeline_mode<synchronous>, transform_indices = @transform_5, window_bounds = array<i64: 32, 32>}, {pipeline_mode = #tpu.pipeline_mode<synchronous>, transform_indices = @transform_6, window_bounds = array<i64: 1, 32>}, {pipeline_mode = #tpu.pipeline_mode<synchronous>, transform_indices = @transform_7, window_bounds = array<i64: 1, 32>}, {pipeline_mode = #tpu.pipeline_mode<synchronous>, transform_indices = @transform_8, window_bounds = array<i64: 32, 64>}, {pipeline_mode = #tpu.pipeline_mode<synchronous>, transform_indices = @transform_9, window_bounds = array<i64: 64, 64>}, {pipeline_mode = #tpu.pipeline_mode<synchronous>, transform_indices = @transform_10, window_bounds = array<i64: 64, 32>}, {pipeline_mode = #tpu.pipeline_mode<synchronous>, transform_indices = @transform_11, window_bounds = array<i64: 1, 32>}, {pipeline_mode = #tpu.pipeline_mode<synchronous>, transform_indices = @transform_12, window_bounds = array<i64: 1, 32>}, {transform_indices = @transform_13, window_bounds = array<i64: 1, 8, 32>}, {transform_indices = @transform_14, window_bounds = array<i64: 1, 4, 8, 8>}]} {
    %c0_i32 = arith.constant 0 : i32
    %0 = arith.cmpi eq, %arg1, %c0_i32 : i32
    %1 = arith.extui %0 : i1 to i32
    %c0_i32_0 = arith.constant 0 : i32
    %2 = arith.cmpi ne, %1, %c0_i32_0 : i32
    scf.if %2 {
      %c0_91 = arith.constant 0 : index
      %c0_92 = arith.constant 0 : index
      %c0_93 = arith.constant 0 : index
      %166 = vector.load %arg2[%c0_91, %c0_92, %c0_93] : memref<1x8x32xbf16, #tpu.memory_space<vmem>>, vector<1x8x32xbf16>
      %167 = vector.shape_cast %166 : vector<1x8x32xbf16> to vector<8x32xbf16>
      %c0_94 = arith.constant 0 : index
      %c0_95 = arith.constant 0 : index
      %168 = vector.load %arg5[%c0_94, %c0_95] : memref<32x32xbf16, #tpu.memory_space<vmem>>, vector<32x32xbf16>
      %cst_96 = arith.constant dense<0.000000e+00> : vector<8x32xf32>
      %169 = tpu.matmul %167, %168, %cst_96 {dimension_numbers = #tpu.dot_dimension_numbers<[1], [0], [0], [1], [0, 0, 1, 1], [], []>} : vector<8x32xbf16>, vector<32x32xbf16>, vector<8x32xf32> -> vector<8x32xf32>
      %170 = arith.truncf %169 : vector<8x32xf32> to vector<8x32xbf16>
      %c0_97 = arith.constant 0 : index
      %c0_98 = arith.constant 0 : index
      %171 = vector.load %arg17[%c0_97, %c0_98] : memref<8x32xbf16, #tpu.memory_space<vmem>>, vector<8x32xbf16>
      tpu.vector_store %arg17[%c0_97, %c0_98], %170 {strides = array<i32>} : memref<8x32xbf16, #tpu.memory_space<vmem>>, vector<8x32xbf16>,
      %c0_99 = arith.constant 0 : index
      %c0_100 = arith.constant 0 : index
      %172 = vector.load %arg6[%c0_99, %c0_100] : memref<32x32xbf16, #tpu.memory_space<vmem>>, vector<32x32xbf16>
      %cst_101 = arith.constant dense<0.000000e+00> : vector<8x32xf32>
      %173 = tpu.matmul %167, %172, %cst_101 {dimension_numbers = #tpu.dot_dimension_numbers<[1], [0], [0], [1], [0, 0, 1, 1], [], []>} : vector<8x32xbf16>, vector<32x32xbf16>, vector<8x32xf32> -> vector<8x32xf32>
      %174 = arith.truncf %173 : vector<8x32xf32> to vector<8x32xbf16>
      %c0_102 = arith.constant 0 : index
      %c0_103 = arith.constant 0 : index
      %175 = vector.load %arg18[%c0_102, %c0_103] : memref<8x32xbf16, #tpu.memory_space<vmem>>, vector<8x32xbf16>
      tpu.vector_store %arg18[%c0_102, %c0_103], %174 {strides = array<i32>} : memref<8x32xbf16, #tpu.memory_space<vmem>>, vector<8x32xbf16>,
    } else {
    }
    %c0 = arith.constant 0 : index
    %c0_1 = arith.constant 0 : index
    %c0_2 = arith.constant 0 : index
    %3 = vector.load %arg3[%c0, %c0_1, %c0_2] : memref<1x8x32xf32, #tpu.memory_space<vmem>>, vector<1x8x32xf32>
    %4 = vector.shape_cast %3 : vector<1x8x32xf32> to vector<8x32xf32>
    %5 = arith.truncf %4 : vector<8x32xf32> to vector<8x32xbf16>
    %c0_3 = arith.constant 0 : index
    %c0_4 = arith.constant 0 : index
    %6 = vector.load %arg4[%c0_3, %c0_4] : memref<32x32xbf16, #tpu.memory_space<vmem>>, vector<32x32xbf16>
    %cst = arith.constant dense<0.000000e+00> : vector<8x32xf32>
    %7 = tpu.matmul %5, %6, %cst {dimension_numbers = #tpu.dot_dimension_numbers<[1], [0], [0], [1], [0, 0, 1, 1], [], []>} : vector<8x32xbf16>, vector<32x32xbf16>, vector<8x32xf32> -> vector<8x32xf32>
    %8 = arith.truncf %7 : vector<8x32xf32> to vector<8x32xbf16>
    %9 = vector.extract_strided_slice %8 {offsets = [0, 0], sizes = [8, 8], strides = [1, 1]} : vector<8x32xbf16> to vector<8x8xbf16>
    %c0_5 = arith.constant 0 : index
    %c0_6 = arith.constant 0 : index
    %10 = vector.load %arg17[%c0_5, %c0_6] : memref<8x32xbf16, #tpu.memory_space<vmem>>, vector<8x8xbf16>
    %c0_7 = arith.constant 0 : index
    %c0_8 = arith.constant 0 : index
    %11 = vector.load %arg18[%c0_7, %c0_8] : memref<8x32xbf16, #tpu.memory_space<vmem>>, vector<8x8xbf16>
    %cst_9 = arith.constant dense<0.000000e+00> : vector<8x8xf32>
    %12 = tpu.matmul %9, %10, %cst_9 {dimension_numbers = #tpu.dot_dimension_numbers<[1], [1], [0], [0], [0, 0, 1, 0], [], []>} : vector<8x8xbf16>, vector<8x8xbf16>, vector<8x8xf32> -> vector<8x8xf32>
    %cst_10 = arith.constant dense<0xFF800000> : vector<8xf32>
    %13 = vector.multi_reduction <maximumf>, %12, %cst_10 [1] : vector<8x8xf32> to vector<8xf32>
    %14 = vector.shape_cast %13 : vector<8xf32> to vector<8x1xf32>
    %15 = vector.broadcast %14 : vector<8x1xf32> to vector<8x8xf32>
    %16 = arith.subf %12, %15 : vector<8x8xf32>
    %17 = math.exp %16 : vector<8x8xf32>
    %cst_11 = arith.constant dense<0.000000e+00> : vector<8xf32>
    %18 = vector.multi_reduction <add>, %17, %cst_11 [1] : vector<8x8xf32> to vector<8xf32>
    %19 = vector.shape_cast %18 : vector<8xf32> to vector<8x1xf32>
    %20 = tpu.reciprocal %19 {approx = true} : vector<8x1xf32> -> vector<8x1xf32>
    %21 = vector.broadcast %20 : vector<8x1xf32> to vector<8x8xf32>
    %22 = arith.mulf %17, %21 : vector<8x8xf32>
    %c0_12 = arith.constant 0 : index
    %c0_13 = arith.constant 0 : index
    %c0_14 = arith.constant 0 : index
    %c0_15 = arith.constant 0 : index
    %23 = vector.load %arg16[%c0_12, %c0_13, %c0_14, %c0_15] : memref<1x4x8x8xf32, #tpu.memory_space<vmem>>, vector<1x1x8x8xf32>
    %24 = vector.shape_cast %23 : vector<1x1x8x8xf32> to vector<8x8xf32>
    %25 = vector.shape_cast %22 : vector<8x8xf32> to vector<1x1x8x8xf32>
    tpu.vector_store %arg16[%c0_12, %c0_13, %c0_14, %c0_15], %25 {strides = array<i32>} : memref<1x4x8x8xf32, #tpu.memory_space<vmem>>, vector<1x1x8x8xf32>,
    %26 = arith.truncf %22 : vector<8x8xf32> to vector<8x8xbf16>
    %cst_16 = arith.constant dense<0.000000e+00> : vector<8x8xf32>
    %27 = tpu.matmul %26, %11, %cst_16 {dimension_numbers = #tpu.dot_dimension_numbers<[1], [0], [0], [1], [0, 0, 1, 1], [], []>} : vector<8x8xbf16>, vector<8x8xbf16>, vector<8x8xf32> -> vector<8x8xf32>
    %28 = arith.truncf %27 : vector<8x8xf32> to vector<8x8xbf16>
    %c0_17 = arith.constant 0 : index
    %c0_18 = arith.constant 0 : index
    %29 = vector.load %arg7[%c0_17, %c0_18] : memref<32x32xbf16, #tpu.memory_space<vmem>>, vector<8x32xbf16>
    %cst_19 = arith.constant dense<0.000000e+00> : vector<8x32xf32>
    %30 = tpu.matmul %28, %29, %cst_19 {dimension_numbers = #tpu.dot_dimension_numbers<[1], [0], [0], [1], [0, 0, 1, 1], [], []>} : vector<8x8xbf16>, vector<8x32xbf16>, vector<8x32xf32> -> vector<8x32xf32>
    %31 = arith.addf %4, %30 : vector<8x32xf32>
    %32 = vector.extract_strided_slice %8 {offsets = [0, 8], sizes = [8, 8], strides = [1, 1]} : vector<8x32xbf16> to vector<8x8xbf16>
    %c0_20 = arith.constant 0 : index
    %c8 = arith.constant 8 : index
    %33 = vector.load %arg17[%c0_20, %c8] : memref<8x32xbf16, #tpu.memory_space<vmem>>, vector<8x8xbf16>
    %c0_21 = arith.constant 0 : index
    %c8_22 = arith.constant 8 : index
    %34 = vector.load %arg18[%c0_21, %c8_22] : memref<8x32xbf16, #tpu.memory_space<vmem>>, vector<8x8xbf16>
    %cst_23 = arith.constant dense<0.000000e+00> : vector<8x8xf32>
    %35 = tpu.matmul %32, %33, %cst_23 {dimension_numbers = #tpu.dot_dimension_numbers<[1], [1], [0], [0], [0, 0, 1, 0], [], []>} : vector<8x8xbf16>, vector<8x8xbf16>, vector<8x8xf32> -> vector<8x8xf32>
    %cst_24 = arith.constant dense<0xFF800000> : vector<8xf32>
    %36 = vector.multi_reduction <maximumf>, %35, %cst_24 [1] : vector<8x8xf32> to vector<8xf32>
    %37 = vector.shape_cast %36 : vector<8xf32> to vector<8x1xf32>
    %38 = vector.broadcast %37 : vector<8x1xf32> to vector<8x8xf32>
    %39 = arith.subf %35, %38 : vector<8x8xf32>
    %40 = math.exp %39 : vector<8x8xf32>
    %cst_25 = arith.constant dense<0.000000e+00> : vector<8xf32>
    %41 = vector.multi_reduction <add>, %40, %cst_25 [1] : vector<8x8xf32> to vector<8xf32>
    %42 = vector.shape_cast %41 : vector<8xf32> to vector<8x1xf32>
    %43 = tpu.reciprocal %42 {approx = true} : vector<8x1xf32> -> vector<8x1xf32>
    %44 = vector.broadcast %43 : vector<8x1xf32> to vector<8x8xf32>
    %45 = arith.mulf %40, %44 : vector<8x8xf32>
    %c0_26 = arith.constant 0 : index
    %c1 = arith.constant 1 : index
    %c0_27 = arith.constant 0 : index
    %c0_28 = arith.constant 0 : index
    %46 = vector.load %arg16[%c0_26, %c1, %c0_27, %c0_28] : memref<1x4x8x8xf32, #tpu.memory_space<vmem>>, vector<1x1x8x8xf32>
    %47 = vector.shape_cast %46 : vector<1x1x8x8xf32> to vector<8x8xf32>
    %48 = vector.shape_cast %45 : vector<8x8xf32> to vector<1x1x8x8xf32>
    tpu.vector_store %arg16[%c0_26, %c1, %c0_27, %c0_28], %48 {strides = array<i32>} : memref<1x4x8x8xf32, #tpu.memory_space<vmem>>, vector<1x1x8x8xf32>,
    %49 = arith.truncf %45 : vector<8x8xf32> to vector<8x8xbf16>
    %cst_29 = arith.constant dense<0.000000e+00> : vector<8x8xf32>
    %50 = tpu.matmul %49, %34, %cst_29 {dimension_numbers = #tpu.dot_dimension_numbers<[1], [0], [0], [1], [0, 0, 1, 1], [], []>} : vector<8x8xbf16>, vector<8x8xbf16>, vector<8x8xf32> -> vector<8x8xf32>
    %51 = arith.truncf %50 : vector<8x8xf32> to vector<8x8xbf16>
    %c8_30 = arith.constant 8 : index
    %c0_31 = arith.constant 0 : index
    %52 = vector.load %arg7[%c8_30, %c0_31] : memref<32x32xbf16, #tpu.memory_space<vmem>>, vector<8x32xbf16>
    %cst_32 = arith.constant dense<0.000000e+00> : vector<8x32xf32>
    %53 = tpu.matmul %51, %52, %cst_32 {dimension_numbers = #tpu.dot_dimension_numbers<[1], [0], [0], [1], [0, 0, 1, 1], [], []>} : vector<8x8xbf16>, vector<8x32xbf16>, vector<8x32xf32> -> vector<8x32xf32>
    %54 = arith.addf %31, %53 : vector<8x32xf32>
    %55 = vector.extract_strided_slice %8 {offsets = [0, 16], sizes = [8, 8], strides = [1, 1]} : vector<8x32xbf16> to vector<8x8xbf16>
    %c0_33 = arith.constant 0 : index
    %c16 = arith.constant 16 : index
    %56 = vector.load %arg17[%c0_33, %c16] : memref<8x32xbf16, #tpu.memory_space<vmem>>, vector<8x8xbf16>
    %c0_34 = arith.constant 0 : index
    %c16_35 = arith.constant 16 : index
    %57 = vector.load %arg18[%c0_34, %c16_35] : memref<8x32xbf16, #tpu.memory_space<vmem>>, vector<8x8xbf16>
    %cst_36 = arith.constant dense<0.000000e+00> : vector<8x8xf32>
    %58 = tpu.matmul %55, %56, %cst_36 {dimension_numbers = #tpu.dot_dimension_numbers<[1], [1], [0], [0], [0, 0, 1, 0], [], []>} : vector<8x8xbf16>, vector<8x8xbf16>, vector<8x8xf32> -> vector<8x8xf32>
    %cst_37 = arith.constant dense<0xFF800000> : vector<8xf32>
    %59 = vector.multi_reduction <maximumf>, %58, %cst_37 [1] : vector<8x8xf32> to vector<8xf32>
    %60 = vector.shape_cast %59 : vector<8xf32> to vector<8x1xf32>
    %61 = vector.broadcast %60 : vector<8x1xf32> to vector<8x8xf32>
    %62 = arith.subf %58, %61 : vector<8x8xf32>
    %63 = math.exp %62 : vector<8x8xf32>
    %cst_38 = arith.constant dense<0.000000e+00> : vector<8xf32>
    %64 = vector.multi_reduction <add>, %63, %cst_38 [1] : vector<8x8xf32> to vector<8xf32>
    %65 = vector.shape_cast %64 : vector<8xf32> to vector<8x1xf32>
    %66 = tpu.reciprocal %65 {approx = true} : vector<8x1xf32> -> vector<8x1xf32>
    %67 = vector.broadcast %66 : vector<8x1xf32> to vector<8x8xf32>
    %68 = arith.mulf %63, %67 : vector<8x8xf32>
    %c0_39 = arith.constant 0 : index
    %c2 = arith.constant 2 : index
    %c0_40 = arith.constant 0 : index
    %c0_41 = arith.constant 0 : index
    %69 = vector.load %arg16[%c0_39, %c2, %c0_40, %c0_41] : memref<1x4x8x8xf32, #tpu.memory_space<vmem>>, vector<1x1x8x8xf32>
    %70 = vector.shape_cast %69 : vector<1x1x8x8xf32> to vector<8x8xf32>
    %71 = vector.shape_cast %68 : vector<8x8xf32> to vector<1x1x8x8xf32>
    tpu.vector_store %arg16[%c0_39, %c2, %c0_40, %c0_41], %71 {strides = array<i32>} : memref<1x4x8x8xf32, #tpu.memory_space<vmem>>, vector<1x1x8x8xf32>,
    %72 = arith.truncf %68 : vector<8x8xf32> to vector<8x8xbf16>
    %cst_42 = arith.constant dense<0.000000e+00> : vector<8x8xf32>
    %73 = tpu.matmul %72, %57, %cst_42 {dimension_numbers = #tpu.dot_dimension_numbers<[1], [0], [0], [1], [0, 0, 1, 1], [], []>} : vector<8x8xbf16>, vector<8x8xbf16>, vector<8x8xf32> -> vector<8x8xf32>
    %74 = arith.truncf %73 : vector<8x8xf32> to vector<8x8xbf16>
    %c16_43 = arith.constant 16 : index
    %c0_44 = arith.constant 0 : index
    %75 = vector.load %arg7[%c16_43, %c0_44] : memref<32x32xbf16, #tpu.memory_space<vmem>>, vector<8x32xbf16>
    %cst_45 = arith.constant dense<0.000000e+00> : vector<8x32xf32>
    %76 = tpu.matmul %74, %75, %cst_45 {dimension_numbers = #tpu.dot_dimension_numbers<[1], [0], [0], [1], [0, 0, 1, 1], [], []>} : vector<8x8xbf16>, vector<8x32xbf16>, vector<8x32xf32> -> vector<8x32xf32>
    %77 = arith.addf %54, %76 : vector<8x32xf32>
    %78 = vector.extract_strided_slice %8 {offsets = [0, 24], sizes = [8, 8], strides = [1, 1]} : vector<8x32xbf16> to vector<8x8xbf16>
    %c0_46 = arith.constant 0 : index
    %c24 = arith.constant 24 : index
    %79 = vector.load %arg17[%c0_46, %c24] : memref<8x32xbf16, #tpu.memory_space<vmem>>, vector<8x8xbf16>
    %c0_47 = arith.constant 0 : index
    %c24_48 = arith.constant 24 : index
    %80 = vector.load %arg18[%c0_47, %c24_48] : memref<8x32xbf16, #tpu.memory_space<vmem>>, vector<8x8xbf16>
    %cst_49 = arith.constant dense<0.000000e+00> : vector<8x8xf32>
    %81 = tpu.matmul %78, %79, %cst_49 {dimension_numbers = #tpu.dot_dimension_numbers<[1], [1], [0], [0], [0, 0, 1, 0], [], []>} : vector<8x8xbf16>, vector<8x8xbf16>, vector<8x8xf32> -> vector<8x8xf32>
    %cst_50 = arith.constant dense<0xFF800000> : vector<8xf32>
    %82 = vector.multi_reduction <maximumf>, %81, %cst_50 [1] : vector<8x8xf32> to vector<8xf32>
    %83 = vector.shape_cast %82 : vector<8xf32> to vector<8x1xf32>
    %84 = vector.broadcast %83 : vector<8x1xf32> to vector<8x8xf32>
    %85 = arith.subf %81, %84 : vector<8x8xf32>
    %86 = math.exp %85 : vector<8x8xf32>
    %cst_51 = arith.constant dense<0.000000e+00> : vector<8xf32>
    %87 = vector.multi_reduction <add>, %86, %cst_51 [1] : vector<8x8xf32> to vector<8xf32>
    %88 = vector.shape_cast %87 : vector<8xf32> to vector<8x1xf32>
    %89 = tpu.reciprocal %88 {approx = true} : vector<8x1xf32> -> vector<8x1xf32>
    %90 = vector.broadcast %89 : vector<8x1xf32> to vector<8x8xf32>
    %91 = arith.mulf %86, %90 : vector<8x8xf32>
    %c0_52 = arith.constant 0 : index
    %c3 = arith.constant 3 : index
    %c0_53 = arith.constant 0 : index
    %c0_54 = arith.constant 0 : index
    %92 = vector.load %arg16[%c0_52, %c3, %c0_53, %c0_54] : memref<1x4x8x8xf32, #tpu.memory_space<vmem>>, vector<1x1x8x8xf32>
    %93 = vector.shape_cast %92 : vector<1x1x8x8xf32> to vector<8x8xf32>
    %94 = vector.shape_cast %91 : vector<8x8xf32> to vector<1x1x8x8xf32>
    tpu.vector_store %arg16[%c0_52, %c3, %c0_53, %c0_54], %94 {strides = array<i32>} : memref<1x4x8x8xf32, #tpu.memory_space<vmem>>, vector<1x1x8x8xf32>,
    %95 = arith.truncf %91 : vector<8x8xf32> to vector<8x8xbf16>
    %cst_55 = arith.constant dense<0.000000e+00> : vector<8x8xf32>
    %96 = tpu.matmul %95, %80, %cst_55 {dimension_numbers = #tpu.dot_dimension_numbers<[1], [0], [0], [1], [0, 0, 1, 1], [], []>} : vector<8x8xbf16>, vector<8x8xbf16>, vector<8x8xf32> -> vector<8x8xf32>
    %97 = arith.truncf %96 : vector<8x8xf32> to vector<8x8xbf16>
    %c24_56 = arith.constant 24 : index
    %c0_57 = arith.constant 0 : index
    %98 = vector.load %arg7[%c24_56, %c0_57] : memref<32x32xbf16, #tpu.memory_space<vmem>>, vector<8x32xbf16>
    %cst_58 = arith.constant dense<0.000000e+00> : vector<8x32xf32>
    %99 = tpu.matmul %97, %98, %cst_58 {dimension_numbers = #tpu.dot_dimension_numbers<[1], [0], [0], [1], [0, 0, 1, 1], [], []>} : vector<8x8xbf16>, vector<8x32xbf16>, vector<8x32xf32> -> vector<8x32xf32>
    %100 = arith.addf %77, %99 : vector<8x32xf32>
    %c0_59 = arith.constant 0 : index
    %c0_60 = arith.constant 0 : index
    %101 = vector.load %arg8[%c0_59, %c0_60] : memref<1x32xf32, #tpu.memory_space<vmem>>, vector<1x32xf32>
    %c0_61 = arith.constant 0 : index
    %c0_62 = arith.constant 0 : index
    %102 = vector.load %arg9[%c0_61, %c0_62] : memref<1x32xf32, #tpu.memory_space<vmem>>, vector<1x32xf32>
    %cst_63 = arith.constant dense<0.000000e+00> : vector<8xf32>
    %103 = vector.multi_reduction <add>, %100, %cst_63 [1] : vector<8x32xf32> to vector<8xf32>
    %104 = vector.shape_cast %103 : vector<8xf32> to vector<8x1xf32>
    %cst_64 = arith.constant 3.200000e+01 : f32
    %105 = vector.broadcast %cst_64 : f32 to vector<8x1xf32>
    %106 = arith.divf %104, %105 : vector<8x1xf32>
    %107 = vector.broadcast %106 : vector<8x1xf32> to vector<8x32xf32>
    %108 = arith.subf %100, %107 : vector<8x32xf32>
    %109 = arith.mulf %108, %108 : vector<8x32xf32>
    %cst_65 = arith.constant dense<0.000000e+00> : vector<8xf32>
    %110 = vector.multi_reduction <add>, %109, %cst_65 [1] : vector<8x32xf32> to vector<8xf32>
    %111 = vector.shape_cast %110 : vector<8xf32> to vector<8x1xf32>
    %cst_66 = arith.constant 0.0322580636 : f32
    %112 = vector.broadcast %cst_66 : f32 to vector<8x1xf32>
    %113 = arith.mulf %111, %112 : vector<8x1xf32>
    %114 = vector.broadcast %106 : vector<8x1xf32> to vector<8x32xf32>
    %115 = arith.subf %100, %114 : vector<8x32xf32>
    %116 = vector.broadcast %101 : vector<1x32xf32> to vector<8x32xf32>
    %117 = arith.mulf %116, %115 : vector<8x32xf32>
    %118 = math.sqrt %113 : vector<8x1xf32>
    %cst_67 = arith.constant 9.99999997E-7 : f32
    %119 = vector.broadcast %cst_67 : f32 to vector<8x1xf32>
    %120 = arith.addf %118, %119 : vector<8x1xf32>
    %121 = vector.broadcast %120 : vector<8x1xf32> to vector<8x32xf32>
    %122 = arith.divf %117, %121 : vector<8x32xf32>
    %123 = vector.broadcast %102 : vector<1x32xf32> to vector<8x32xf32>
    %124 = arith.addf %122, %123 : vector<8x32xf32>
    %125 = arith.truncf %124 : vector<8x32xf32> to vector<8x32xbf16>
    %c0_68 = arith.constant 0 : index
    %c0_69 = arith.constant 0 : index
    %126 = vector.load %arg10[%c0_68, %c0_69] : memref<32x64xbf16, #tpu.memory_space<vmem>>, vector<32x64xbf16>
    %cst_70 = arith.constant dense<0.000000e+00> : vector<8x64xf32>
    %127 = tpu.matmul %125, %126, %cst_70 {dimension_numbers = #tpu.dot_dimension_numbers<[1], [0], [0], [1], [0, 0, 1, 1], [], []>} : vector<8x32xbf16>, vector<32x64xbf16>, vector<8x64xf32> -> vector<8x64xf32>
    %cst_71 = arith.constant 0.000000e+00 : f32
    %128 = vector.broadcast %cst_71 : f32 to vector<8x64xf32>
    %129 = arith.maximumf %127, %128 : vector<8x64xf32>
    %130 = arith.truncf %129 : vector<8x64xf32> to vector<8x64xbf16>
    %c0_72 = arith.constant 0 : index
    %c0_73 = arith.constant 0 : index
    %131 = vector.load %arg11[%c0_72, %c0_73] : memref<64x64xbf16, #tpu.memory_space<vmem>>, vector<64x64xbf16>
    %cst_74 = arith.constant dense<0.000000e+00> : vector<8x64xf32>
    %132 = tpu.matmul %130, %131, %cst_74 {dimension_numbers = #tpu.dot_dimension_numbers<[1], [0], [0], [1], [0, 0, 1, 1], [], []>} : vector<8x64xbf16>, vector<64x64xbf16>, vector<8x64xf32> -> vector<8x64xf32>
    %cst_75 = arith.constant 0.000000e+00 : f32
    %133 = vector.broadcast %cst_75 : f32 to vector<8x64xf32>
    %134 = arith.maximumf %132, %133 : vector<8x64xf32>
    %135 = arith.truncf %134 : vector<8x64xf32> to vector<8x64xbf16>
    %c0_76 = arith.constant 0 : index
    %c0_77 = arith.constant 0 : index
    %136 = vector.load %arg12[%c0_76, %c0_77] : memref<64x32xbf16, #tpu.memory_space<vmem>>, vector<64x32xbf16>
    %cst_78 = arith.constant dense<0.000000e+00> : vector<8x32xf32>
    %137 = tpu.matmul %135, %136, %cst_78 {dimension_numbers = #tpu.dot_dimension_numbers<[1], [0], [0], [1], [0, 0, 1, 1], [], []>} : vector<8x64xbf16>, vector<64x32xbf16>, vector<8x32xf32> -> vector<8x32xf32>
    %138 = arith.addf %137, %124 : vector<8x32xf32>
    %c0_79 = arith.constant 0 : index
    %c0_80 = arith.constant 0 : index
    %139 = vector.load %arg13[%c0_79, %c0_80] : memref<1x32xf32, #tpu.memory_space<vmem>>, vector<1x32xf32>
    %c0_81 = arith.constant 0 : index
    %c0_82 = arith.constant 0 : index
    %140 = vector.load %arg14[%c0_81, %c0_82] : memref<1x32xf32, #tpu.memory_space<vmem>>, vector<1x32xf32>
    %cst_83 = arith.constant dense<0.000000e+00> : vector<8xf32>
    %141 = vector.multi_reduction <add>, %138, %cst_83 [1] : vector<8x32xf32> to vector<8xf32>
    %142 = vector.shape_cast %141 : vector<8xf32> to vector<8x1xf32>
    %cst_84 = arith.constant 3.200000e+01 : f32
    %143 = vector.broadcast %cst_84 : f32 to vector<8x1xf32>
    %144 = arith.divf %142, %143 : vector<8x1xf32>
    %145 = vector.broadcast %144 : vector<8x1xf32> to vector<8x32xf32>
    %146 = arith.subf %138, %145 : vector<8x32xf32>
    %147 = arith.mulf %146, %146 : vector<8x32xf32>
    %cst_85 = arith.constant dense<0.000000e+00> : vector<8xf32>
    %148 = vector.multi_reduction <add>, %147, %cst_85 [1] : vector<8x32xf32> to vector<8xf32>
    %149 = vector.shape_cast %148 : vector<8xf32> to vector<8x1xf32>
    %cst_86 = arith.constant 0.0322580636 : f32
    %150 = vector.broadcast %cst_86 : f32 to vector<8x1xf32>
    %151 = arith.mulf %149, %150 : vector<8x1xf32>
    %152 = vector.broadcast %144 : vector<8x1xf32> to vector<8x32xf32>
    %153 = arith.subf %138, %152 : vector<8x32xf32>
    %154 = vector.broadcast %139 : vector<1x32xf32> to vector<8x32xf32>
    %155 = arith.mulf %154, %153 : vector<8x32xf32>
    %156 = math.sqrt %151 : vector<8x1xf32>
    %cst_87 = arith.constant 9.99999997E-7 : f32
    %157 = vector.broadcast %cst_87 : f32 to vector<8x1xf32>
    %158 = arith.addf %156, %157 : vector<8x1xf32>
    %159 = vector.broadcast %158 : vector<8x1xf32> to vector<8x32xf32>
    %160 = arith.divf %155, %159 : vector<8x32xf32>
    %161 = vector.broadcast %140 : vector<1x32xf32> to vector<8x32xf32>
    %162 = arith.addf %160, %161 : vector<8x32xf32>
    %c0_88 = arith.constant 0 : index
    %c0_89 = arith.constant 0 : index
    %c0_90 = arith.constant 0 : index
    %163 = vector.load %arg15[%c0_88, %c0_89, %c0_90] : memref<1x8x32xf32, #tpu.memory_space<vmem>>, vector<1x8x32xf32>
    %164 = vector.shape_cast %163 : vector<1x8x32xf32> to vector<8x32xf32>
    %165 = vector.shape_cast %162 : vector<8x32xf32> to vector<1x8x32xf32>
    tpu.vector_store %arg15[%c0_88, %c0_89, %c0_90], %165 {strides = array<i32>} : memref<1x8x32xf32, #tpu.memory_space<vmem>>, vector<1x8x32xf32>,
    return
  }
  func.func @transform_0(%arg0: i32, %arg1: i32) -> (i32, i32, i32) {
    %c0_i32 = arith.constant 0 : i32
    %c0_i32_0 = arith.constant 0 : i32
    %c0_i32_1 = arith.constant 0 : i32
    return %arg0, %c0_i32, %c0_i32_0 : i32, i32, i32
  }
  func.func @transform_1(%arg0: i32, %arg1: i32) -> (i32, i32, i32) {
    %c0_i32 = arith.constant 0 : i32
    %c0_i32_0 = arith.constant 0 : i32
    return %arg0, %arg1, %c0_i32 : i32, i32, i32
  }
  func.func @transform_2(%arg0: i32, %arg1: i32) -> (i32, i32) {
    %c0_i32 = arith.constant 0 : i32
    %c0_i32_0 = arith.constant 0 : i32
    %c0_i32_1 = arith.constant 0 : i32
    return %c0_i32, %c0_i32_0 : i32, i32
  }
  func.func @transform_3(%arg0: i32, %arg1: i32) -> (i32, i32) {
    %c0_i32 = arith.constant 0 : i32
    %c0_i32_0 = arith.constant 0 : i32
    %c0_i32_1 = arith.constant 0 : i32
    return %c0_i32, %c0_i32_0 : i32, i32
  }
  func.func @transform_4(%arg0: i32, %arg1: i32) -> (i32, i32) {
    %c0_i32 = arith.constant 0 : i32
    %c0_i32_0 = arith.constant 0 : i32
    %c0_i32_1 = arith.constant 0 : i32
    return %c0_i32, %c0_i32_0 : i32, i32
  }
  func.func @transform_5(%arg0: i32, %arg1: i32) -> (i32, i32) {
    %c0_i32 = arith.constant 0 : i32
    %c0_i32_0 = arith.constant 0 : i32
    %c0_i32_1 = arith.constant 0 : i32
    return %c0_i32, %c0_i32_0 : i32, i32
  }
  func.func @transform_6(%arg0: i32, %arg1: i32) -> (i32, i32) {
    %c0_i32 = arith.constant 0 : i32
    %c0_i32_0 = arith.constant 0 : i32
    %c0_i32_1 = arith.constant 0 : i32
    return %c0_i32, %c0_i32_0 : i32, i32
  }
  func.func @transform_7(%arg0: i32, %arg1: i32) -> (i32, i32) {
    %c0_i32 = arith.constant 0 : i32
    %c0_i32_0 = arith.constant 0 : i32
    %c0_i32_1 = arith.constant 0 : i32
    return %c0_i32, %c0_i32_0 : i32, i32
  }
  func.func @transform_8(%arg0: i32, %arg1: i32) -> (i32, i32) {
    %c0_i32 = arith.constant 0 : i32
    %c0_i32_0 = arith.constant 0 : i32
    %c0_i32_1 = arith.constant 0 : i32
    return %c0_i32, %c0_i32_0 : i32, i32
  }
  func.func @transform_9(%arg0: i32, %arg1: i32) -> (i32, i32) {
    %c0_i32 = arith.constant 0 : i32
    %c0_i32_0 = arith.constant 0 : i32
    %c0_i32_1 = arith.constant 0 : i32
    return %c0_i32, %c0_i32_0 : i32, i32
  }
  func.func @transform_10(%arg0: i32, %arg1: i32) -> (i32, i32) {
    %c0_i32 = arith.constant 0 : i32
    %c0_i32_0 = arith.constant 0 : i32
    %c0_i32_1 = arith.constant 0 : i32
    return %c0_i32, %c0_i32_0 : i32, i32
  }
  func.func @transform_11(%arg0: i32, %arg1: i32) -> (i32, i32) {
    %c0_i32 = arith.constant 0 : i32
    %c0_i32_0 = arith.constant 0 : i32
    %c0_i32_1 = arith.constant 0 : i32
    return %c0_i32, %c0_i32_0 : i32, i32
  }
  func.func @transform_12(%arg0: i32, %arg1: i32) -> (i32, i32) {
    %c0_i32 = arith.constant 0 : i32
    %c0_i32_0 = arith.constant 0 : i32
    %c0_i32_1 = arith.constant 0 : i32
    return %c0_i32, %c0_i32_0 : i32, i32
  }
  func.func @transform_13(%arg0: i32, %arg1: i32) -> (i32, i32, i32) {
    %c0_i32 = arith.constant 0 : i32
    %c0_i32_0 = arith.constant 0 : i32
    return %arg0, %arg1, %c0_i32 : i32, i32, i32
  }
  func.func @transform_14(%arg0: i32, %arg1: i32) -> (i32, i32, i32, i32) {
    %c0_i32 = arith.constant 0 : i32
    %c0_i32_0 = arith.constant 0 : i32
    %c0_i32_1 = arith.constant 0 : i32
    return %arg0, %c0_i32, %arg1, %c0_i32_0 : i32, i32, i32, i32
  }
}

</mosaic_0001>

<bundles_post_ra>
// kernel: tpu_custom_call.1
= control target key start
LH: loop header
LB: loop body
LE: loop exit
PB: predicated region body
PF: predicated region fallthrough
CT: control target
= control target key end

     0   :  { %s2586_s0 = inlined_call_operand.vmem [shape: bf16[2,8,32], index: 0, kind: input, shape index: {}]   ;;  %s2587_s1 = inlined_call_operand.vmem [shape: f32[2,8,32], index: 1, kind: input, shape index: {}]   ;;  %s2588_s2 = inlined_call_operand.hbm [shape: bf16[32,32], index: 2, kind: input, shape index: {}]   ;;  %s2589_s3 = inlined_call_operand.hbm [shape: bf16[32,32], index: 3, kind: input, shape index: {}]   ;;  %s2590_s4 = inlined_call_operand.hbm [shape: bf16[32,32], index: 4, kind: input, shape index: {}]   ;;  %s2591_s5 = inlined_call_operand.hbm [shape: bf16[32,32], index: 5, kind: input, shape index: {}]   ;;  %s2592_s6 = inlined_call_operand.hbm [shape: f32[1,32], index: 6, kind: input, shape index: {}]   ;;  %s2593_s7 = inlined_call_operand.hbm [shape: f32[1,32], index: 7, kind: input, shape index: {}]   ;;  %s2594_s8 = inlined_call_operand.hbm [shape: bf16[32,64], index: 8, kind: input, shape index: {}]   ;;  %s2595_s9 = inlined_call_operand.vmem [shape: bf16[64,64], index: 9, kind: input, shape index: {}]   ;;  %s2596_s10 = inlined_call_operand.vmem [shape: bf16[64,32], index: 10, kind: input, shape index: {}]   ;;  %s2597_s11 = inlined_call_operand.vmem [shape: f32[1,32], index: 11, kind: input, shape index: {}]   ;;  %s2598_s12 = inlined_call_operand.vmem [shape: f32[1,32], index: 12, kind: input, shape index: {}]   ;;  %s2599_s13 = inlined_call_operand.hbm [shape: f32[2,8,32], index: 13, kind: output, shape index: {0}]   ;;  %s2600_s14 = inlined_call_operand.hbm [shape: f32[2,4,8,8], index: 14, kind: output, shape index: {1}]  }
   0x1   :  { %2609 = sst [smem:[#allocation32_spill]] %s2589_s3 }
   0x2   :  { %2610 = sst [smem:[#allocation33_spill]] %s2591_s5 }
   0x3   :  { %2611 = sst [smem:[#allocation34_spill]] %s2593_s7 }
   0x4   :  { %2612 = sst [smem:[#allocation35_spill]] %s2598_s12 }
   0x5   :  { %2613 = sst [smem:[#allocation36_spill]] %s2599_s13 }
   0x6   :  { %20 = vsyncpa [#allocation5], 0 }
   0x7   :  { %21 = vsyncpa [#allocation8], 0 }
   0x8   :  { %22 = vsyncpa [#allocation11], 0 }
   0x9   :  { %23 = vsyncpa [#allocation14], 0 }
   0xa   :  { %24 = vsyncpa [#allocation6], 0 }
   0xb   :  { %26 = vsyncpa [#allocation6 + $0x1], 0 }
   0xc   :  { %27 = vsyncpa [#allocation18], 0 }
   0xd   :  { %29 = vsyncpa [#allocation18 + $0x1], 0  ;;  %s2277_s29 = smov 0   ;;  %s2279_s30 = smov 0  }
   0xe   :  { %s2281_s15 = smov 0   ;;  %s2283_s16 = smov 0  }
   0xf   :  { %s2285_s17 = smov 0   ;;  %s2287_s18 = smov 0  }
  0x10 LB: > { %2614 = sst [smem:[#allocation25_spill]] %s2165_s29  ;;  %s1548_s19 = sadd.s32 4294967295, %s2185_s18   ;;  %s2185_s18 = sphi %s2287_s18, %s35_s18   ;;  %s2181_s17 = sphi %s2285_s17, %s2637_s17   ;;  %s2177_s16 = sphi %s2283_s16, %s2636_s16   ;;  %s2173_s15 = sphi %s2281_s15, %s2635_s15   ;;  %s2169_s30 = sphi %s2279_s30, %s2639_s30   ;;  %s2165_s29 = sphi %s2277_s29, %s2638_s29  }
  0x11   : > { %2615 = sst [smem:[#allocation26_spill]] %s2173_s15  ;;  %s1549_s20 = sadd.s32 4294967294, %s2185_s18  }
  0x12   : > { %2616 = sst [smem:[#allocation27_spill]] %s2181_s17  ;;  %s47_s21 = sadd.s32 1, %s2181_s17 }
  0x13   : > { %2617 = sst [smem:[#allocation28_spill]] %s2185_s18  ;;  %s341_s22 = sadd.s32 1, %s2173_s15 }
  0x14   : > { %p49_p0 = scmp.ge.s32.totalorder %s47_s21, 2  ;;  %p351_p1 = scmp.ne.s32.totalorder %s2173_s15, %s2169_s30 }
  0x15   : > { %p352_p2 = scmp.eq.s32.totalorder %s1548_s19, 1  ;;  %p357_p3 = scmp.ne.s32.totalorder %s2169_s30, %s2165_s29 }
  0x16   : > { %s2641_s21 = smov (%p49_p0, %s47_s21), 0  ;;  %p358_p5 = scmp.eq.s32.totalorder %s1549_s20, 1 }
  0x17   : > { %2618 = sst [smem:[#allocation29_spill]] %s2641_s21  ;;  %p2317_p4 = por %p352_p2, %p351_p1 }
  0x18   : > { %s336_s24 = ssub.s32 %s2181_s17, %s2641_s21  ;;  %p1550_p6 = scmp.ge.s32.totalorder %s2185_s18, 1 }
  0x19   : > { %p339_p7 = scmp.eq.s32.totalorder %s336_s24, 0  ;;  %p2324_p8 = por %p358_p5, %p357_p3 }
  0x1a   : > { %p393_p9 = scmp.lt.s32.totalorder %s2185_s18, 3  ;;  %p2336_p11 = scmp.eq.s32.totalorder %s1548_s19, 0 }
  0x1b   : > { %s2620_s25 = scalar_select %p2324_p8, 1, 0 }
  0x1c   : > { %s2330_s26 = scalar_select %p339_p7, %s2173_s15, %s341_s22  }
  0x1d   : > { %2621 = sst [smem:[#allocation30_spill]] %s2620_s25  ;;  %p2332_p10 = pnand %p1550_p6, %p393_p9 }
  0x1e   : > { %2622 = sst [smem:[#allocation31_spill]] %s2330_s26  ;;  %s2187_s17 = smov [#allocation7]  }
  0x1f   : > { %p1712_p12 = pneg %p2332_p10  ;;  %s2625_s3 = sld [smem:[#allocation32_spill]] }
  0x20   : > { %s420_s19 = sshll.u32 %s2187_s17, 4  ;;  %s2627_s5 = sld [smem:[#allocation33_spill]]  ;;  %s421_s19 = int_to_ptr.vmem [resolvable:$true] %s420_s19 }
  0x21   : > { %p2347_p13 = pnand %p2336_p11, %p1712_p12  ;;  %s2188_s29 = smov 64  }
  0x22   : > { %s2189_s20 = smov 4   ;;  %s2628_s7 = sld [smem:[#allocation34_spill]] }
  0x23   : > { %s2190_s17 = smov [#allocation10]   ;;  %s2191_s15 = smov [#allocation13]  }
  0x24   : > { %s448_s12 = sshll.u32 %s2190_s17, 4  ;;  %s475_s26 = sshll.u32 %s2191_s15, 4  ;;  %s449_s12 = int_to_ptr.vmem [resolvable:$true] %s448_s12  ;;  %s476_s26 = int_to_ptr.vmem [resolvable:$true] %s475_s26 }
  0x25   : > { %s418_s21 = sshll.u32 %s2625_s3, 4  ;;  %s404_s3 = sshll.u32 %s2588_s2, 4  ;;  %s419_s21 = int_to_ptr.hbm [resolvable:$true] %s418_s21  ;;  %s405_s3 = int_to_ptr.hbm [resolvable:$true] %s404_s3 }
  0x26   : > { %s446_s25 = sshll.u32 %s2627_s5, 4  ;;  %s2192_s24 = smov [#allocation4]   ;;  %s447_s25 = int_to_ptr.hbm [resolvable:$true] %s446_s25 }
  0x27   : > { %1718 = dma.hbm_to_vmem [thread:$0]  (!%p2347_p13), %s419_s21, 256, %s421_s19, [#allocation8], %s2188_s29, %s2188_s29, %s2189_s20  }
  0x28   : > { %s473_s18 = sshll.u32 %s2628_s7, 4  ;;  %s406_s17 = sshll.u32 %s2192_s24, 4  ;;  %s474_s18 = int_to_ptr.hbm [resolvable:$true] %s473_s18  ;;  %s407_s17 = int_to_ptr.vmem [resolvable:$true] %s406_s17 }
  0x29   : > { %1724 = dma.hbm_to_vmem [thread:$0]  (!%p2347_p13), %s447_s25, 256, %s449_s12, [#allocation11], %s2188_s29, %s2188_s29, %s2189_s20  }
  0x2a   : > { %1730 = dma.hbm_to_vmem [thread:$0]  (!%p2347_p13), %s474_s18, 16, %s476_s26, [#allocation14]  }
  0x2b   : > { %s432_s13 = sshll.u32 %s2590_s4, 4  ;;  %s2193_s12 = smov [#allocation9]   ;;  %s433_s13 = int_to_ptr.hbm [resolvable:$true] %s432_s13 }
  0x2c   : > { %1715 = dma.hbm_to_vmem [thread:$0]  (!%p2347_p13), %s405_s3, 256, %s407_s17, [#allocation5], %s2188_s29, %s2188_s29, %s2189_s20  }
  0x2d   : > { %s434_s18 = sshll.u32 %s2193_s12, 4  ;;  %s461_s26 = sshll.u32 %s2592_s6, 4  ;;  %s435_s18 = int_to_ptr.vmem [resolvable:$true] %s434_s18  ;;  %s462_s26 = int_to_ptr.hbm [resolvable:$true] %s461_s26 }
  0x2e   : > { %1721 = dma.hbm_to_vmem [thread:$0]  (!%p2347_p13), %s433_s13, 256, %s435_s18, [#allocation8], %s2188_s29, %s2188_s29, %s2189_s20  }
  0x2f   : > { %s484_s21 = sshll.u32 %s2594_s8, 4  ;;  %s2194_s19 = smov [#allocation12]   ;;  %s485_s21 = int_to_ptr.hbm [resolvable:$true] %s484_s21 }
  0x30   : > { %s463_s3 = sshll.u32 %s2194_s19, 4  ;;  %s2195_s24 = smov [#allocation15]   ;;  %s464_s3 = int_to_ptr.vmem [resolvable:$true] %s463_s3 }
  0x31   : > { %1727 = dma.hbm_to_vmem [thread:$0]  (!%p2347_p13), %s462_s26, 16, %s464_s3, [#allocation11]  }
  0x32   : > { %s486_s17 = sshll.u32 %s2195_s24, 4  ;;  %531 = sbr.rel (%p2332_p10) target bundleno = 2487 (0x9b7), region = 72  ;;  %s487_s17 = int_to_ptr.vmem [resolvable:$true] %s486_s17 }
  0x33   : > { %1733 = dma.hbm_to_vmem [thread:$0]  (!%p2347_p13), %s485_s21, 256, %s487_s17, [#allocation14], %s2188_s29, %s2188_s29, %s2189_s20  }
  0x37   : > { %2140 = dma.done.wait (%p2336_p11), [#allocation5], 256  }
  0x38   : > { %2142 = vsyncadd (%p2336_p11), [#allocation5], 4294967040 }
  0x39   : > { %2144 = dma.done.wait (%p2336_p11), [#allocation8], 512  }
  0x3a   : > { %2146 = vsyncadd (%p2336_p11), [#allocation8], 4294966784 }
  0x3b   : > { %2148 = dma.done.wait (%p2336_p11), [#allocation11], 272  }
  0x3c   : > { %2150 = vsyncadd (%p2336_p11), [#allocation11], 4294967024 }
  0x3d   : > { %2152 = dma.done.wait (%p2336_p11), [#allocation14], 272  }
  0x3e   : > { %2154 = vsyncadd (%p2336_p11), [#allocation14], 4294967024  ;;  %p619_p0 = scmp.lt.s32.totalorder %s2177_s16, 1  ;;  %v1664_v0 = vld [vmem:[#allocation7 + $0x8] sm:$0xff]  ;;  %v1663_v1 = vld [vmem:[#allocation7] sm:$0xff]  ;;  %vm652_vm0 = vcmask 261120  }
  0x3f   : > { %v1668_v2 = vld [vmem:[#allocation4 + $0x8] sm:$0xff]  ;;  %v1667_v3 = vld [vmem:[#allocation4] sm:$0xff]  ;;  %662 = vmatpush.bf16.msra.mxu0 %v1664_v0  ;;  %vm670_vm1 = vcmask 257024   ;;  %vm741_vm2 = vcmask 64512   ;;  %s2196_s15 = smov 120   ;;  %s2197_s26 = smov 104  }
  0x40   : > { %s620_s13 = scalar_select %p619_p0, %s2177_s16, 1  ;;  %v1666_v4 = vld [vmem:[#allocation9 + $0x8] sm:$0xff]  ;;  %v1665_v6 = vld [vmem:[#allocation9] sm:$0xff]  ;;  %731 = vmatpush.bf16.msra.mxu2 %v1668_v2  ;;  %vm777_vm3 = vcmask 1043456   ;;  %v886_v50 = vld [vmem:[#allocation10 + $0x4] sm:$0xf] }
  0x41   : > { %694 = vmatpush.bf16.msra.mxu1 %v1666_v4  ;;  %s2198_s5 = smov 112   ;;  %v891_v51 = vsel %vm777_vm3, %v886_v50, 0  ;;  %v795_v52 = vld [vmem:[#allocation10] sm:$0xf]  ;;  %s2449_s7 = sand.u32 1, %s2169_s30   ;;  %vm1205_vm11 = vcmask 523264  }
  0x42   : > { %s1570_s29 = sshll.u32 %s620_s13, 3  ;;  %s1569_s12 = sshll.u32 %s620_s13, 2  ;;  %v800_v53 = vsel %vm777_vm3, %v795_v52, 0 }
  0x43   : > { %s629_s20 = scalar_lea.vmem %s2587_s1, %s1570_s29  ;;  %s622_s25 = scalar_lea.vmem %s2586_s0, %s1569_s12  ;;  %663 = vmatpush.bf16.msra.mxu0 %v1663_v1 }
  0x44   : > { %v2421_v5 = vld [vmem:[%s629_s20] sm:$0xff]  ;;  %732 = vmatpush.bf16.msra.mxu2 %v1667_v3  ;;  %s1568_s21 = sshll.u32 %s2449_s7, 5  ;;  %s1679_s3 = sshll.u32 %s2177_s16, 5 }
  0x45   : > { %v635_v7 = vld [vmem:[%s622_s25] sm:$0xf]  ;;  %v704_v8 = vpack.c.bf16 %v2421_v5, %v2421_v5  ;;  %695 = vmatpush.bf16.msra.mxu1 %v1665_v6  ;;  %s2453_s19 = scalar_lea.vmem [#allocation17], %s1568_s21  ;;  %s1354_s13 = scalar_lea.hbm %s2600_s14, %s1679_s3 }
  0x46   : > { %1579 = vmatmul.msk.bf16.vlgmr.msra.gmra.mxu0 %vm652_vm0, %v635_v7  ;;  %s1355_s29 = sshll.u32 %s2453_s19, 4  ;;  %s1357_s27 = sshll.u32 %s1354_s13, 4  ;;  %s1356_s29 = int_to_ptr.vmem [resolvable:$true] %s1355_s29  ;;  %s1358_s27 = int_to_ptr.hbm [resolvable:$true] %s1357_s27 }
  0x47   : > { %1597 = vmatmul.msk.bf16.vlgmr.msra.gmra.mxu2 %vm652_vm0, %v704_v8  ;;  %s1327_s22 = scalar_lea.sflag [#allocation18], %s2449_s7  ;;  %s2073_s20 = sshra.s32 %s1358_s27, 4  ;;  %s2074_s20 = int_to_ptr.hbm [resolvable:$true] %s2073_s20 }
  0x48   : > { %1588 = vmatmul.msk.bf16.vlgmr.msra.gmra.mxu1 %vm652_vm0, %v635_v7  ;;  %s2075_s12 = scalar_lea.hbm %s2074_s20, 32  ;;  %s2079_s25 = scalar_lea.hbm %s2600_s14, 64 }
  0x49   : > { %809 = vmatpush.bf16.msrb.mxu1 %v800_v53  ;;  %v974_v53 = vld [vmem:[#allocation10 + $0x8] sm:$0xf]  ;;  %p2076_p1 = scmp.ne.s32.totalorder %s2074_s20, %s2075_s12  ;;  %p2080_p5 = scmp.lt.s32.totalorder %s2074_s20, %s2600_s14 }
  0x4a   : > { %p2081_p6 = scmp.lt.s32.totalorder %s2079_s25, %s2075_s12 }
  0x4b   : > { %p2077_p2 = pnand %p2076_p1, %p2317_p4 }
  0x4c   : > { %p2082_p7 = por %p2081_p6, %p2080_p5 }
  0x4d   : > { %p2078_p3 = pneg %p2077_p2 }
  0x4f   : > { %p2083_p9 = pnand %p2082_p7, %p2078_p3 }
  0xc3   : > { %v665_v9 = vpop.f32.mrf.mxu0 }
  0xc4   : > { %v669_v10 = vpack.c.bf16 %v665_v9, %v665_v9 }
  0xc5   : > { %v697_v11 = vpop.f32.mrf.mxu1 }
  0xc6   : > { %v701_v12 = vpack.c.bf16 %v697_v11, %v697_v11  ;;  %671 = vst.msk [vmem:[#allocation2] sm:$0xf] %vm670_vm1, %v669_v10 }
  0xc8   : > { %702 = vst.msk [vmem:[#allocation3] sm:$0xf] %vm670_vm1, %v701_v12 }
  0xca   : > { %v734_v13 = vpop.f32.mrf.mxu2 }
  0xcb   : > { %v667_v14 = vpop.f32.mrf.mxu0  ;;  %v738_v20 = vpack.c.bf16 %v734_v13, %v734_v13 }
  0xcd   : > { %v699_v15 = vpop.f32.mrf.mxu1  ;;  %v739_v16 = vld [vmem:[#allocation2] sm:$0xf]  ;;  %v819_v22 = vunpack.c.l.b16 %v738_v20 }
  0xce   : > { %v816_v17 = vld [vmem:[#allocation2] sm:$0xf]  ;;  %v746_v18 = vsel %vm741_vm2, %v739_v16, 0 }
  0xcf   : > { %v824_v19 = vunpack.c.l.b16 %v816_v17  ;;  %755 = vmatpush.bf16.xpose.msra.mxu3 %v746_v18  ;;  %v2432_v24 = vpack.c.b16 %v819_v22, %v819_v22  ;;  %v817_v25 = vld [vmem:[#allocation3] sm:$0xf]  ;;  %v995_v28 = vld [vmem:[#allocation2] sm:$0xf] }
  0xd0   : > { %v862_v26 = vunpack.c.l.b16 %v817_v25  ;;  %v1000_v29 = vunpack.c.l.b16 %v995_v28  ;;  %v907_v45 = vld [vmem:[#allocation2] sm:$0xf]  ;;  %v740_v48 = vld [vmem:[#allocation3] sm:$0xf] }
  0xd1   : > { %v825_v21 = vpack.c.b16 %v824_v19, %v824_v19  ;;  %v912_v46 = vunpack.c.l.b16 %v907_v45  ;;  %v779_v49 = vsel %vm777_vm3, %v740_v48, 0 }
  0xd2   : > { %v736_v23 = vpop.f32.mrf.mxu2  ;;  %v863_v27 = vpack.c.b16 %v862_v26, %v862_v26  ;;  %v1001_v30 = vpack.c.b16 %v1000_v29, %v1000_v29  ;;  %788 = vmatpush.bf16.msrb.mxu0 %v779_v49 }
  0xd3   : > { %826 = vrot.lane.b32.xlu0 %v825_v21, %s2196_s15  ;;  %v913_v47 = vpack.c.b16 %v912_v46, %v912_v46 }
  0xd6   : > { %1598 = vmatmul.msk.bf16.vlgmr.msra.gmra.mxu3 %vm741_vm2, %v738_v20  ;;  %900 = vmatpush.bf16.msra.mxu0 %v891_v51 }
  0xdb   : > { %821 = vrot.lane.b32.xlu0 %v2432_v24, %s2196_s15 }
  0xe3   : > { %864 = vrot.lane.b32.xlu0 %v863_v27, %s2196_s15 }
  0xeb   : > { %1002 = vrot.lane.b32.xlu0 %v1001_v30, %s2197_s26 }
  0xf3   : > { %997 = vrot.lane.b32.xlu0 %v2432_v24, %s2197_s26 }
 0x145   : > { %v827_v31 = vpop.permute.xlu0 %826 }
 0x146   : > { %v832_v32 = vsel %vm741_vm2, %v827_v31, 0 }
 0x147   : > { %841 = vmatpush.bf16.xpose.msrb.mxu2 %v832_v32 }
 0x14d   : > { %v822_v33 = vpop.permute.xlu0 %821 }
 0x14e   : > { %1601 = vmatmul.msk.bf16.vlgmr.msrb.gmra.mxu2 %vm741_vm2, %v822_v33 }
 0x155   : > { %v865_v57 = vpop.permute.xlu0 %864 }
 0x156   : > { %v870_v4 = vsel %vm777_vm3, %v865_v57, 0 }
 0x157   : > { %879 = vmatpush.bf16.msrb.mxu3 %v870_v4 }
 0x159   : > { %v757_v34 = vpop.f32.mrf.mxu3 }
 0x15a   : > { %v761_v35 = vsel %vm741_vm2, %v757_v34, -inf }
 0x15b   : > { %762 = vmax.xlane.f32.xlu1 %v761_v35  ;;  %v908_v35 = vld [vmem:[#allocation3] sm:$0xf] }
 0x15d   : > { %v1003_v63 = vpop.permute.xlu0 %1002 }
 0x15e   : > { %v1008_v1 = vsel %vm741_vm2, %v1003_v63, 0 }
 0x161   : > { %v759_v36 = vpop.f32.mrf.mxu3 }
 0x162   : > { %v950_v36 = vunpack.c.l.b16 %v908_v35 }
 0x165   : > { %v998_v19 = vpop.permute.xlu0 %997 }
 0x1ce   : > { %v763_v37 = vpop.xlane.xlu1 %762 }
 0x1cf   : > { %v764_v38 = vsub.f32 %v757_v34, %v763_v37  ;;  %v951_v37 = vpack.c.b16 %v950_v36, %v950_v36 }
 0x1d1   : > { %v843_v39 = vpop.f32.mrf.mxu2  ;;  %v765_v40 = vmul.f32 1.442695, %v764_v38 }
 0x1d2   : > { %v847_v41 = vsel %vm741_vm2, %v843_v39, -inf }
 0x1d3   : > { %848 = vmax.xlane.f32.xlu1 %v847_v41  ;;  %1823 = vpow2.f32 %v765_v40 }
 0x1d9   : > { %v845_v42 = vpop.f32.mrf.mxu2  ;;  %v1824_v43 = vpop.eup %1823 }
 0x1da   : > { %v767_v44 = vsel %vm741_vm2, %v1824_v43, 0.0 }
 0x1db   : > { %768 = vadd.xlane.f32.xlu2 %v767_v44 }
 0x1ec   : > { %914 = vrot.lane.b32.xlu1 %v913_v47, %s2198_s5 }
 0x246   : > { %v849_v54 = vpop.xlane.xlu1 %848 }
 0x247   : > { %v850_v55 = vsub.f32 %v843_v39, %v849_v54  ;;  %v979_v54 = vsel %vm777_vm3, %v974_v53, 0 }
 0x248   : > { %988 = vmatpush.bf16.msra.mxu3 %v979_v54 }
 0x249   : > { %v851_v56 = vmul.f32 1.442695, %v850_v55  ;;  %v1062_v55 = vld [vmem:[#allocation10 + $0xc] sm:$0xf] }
 0x24b   : > { %1825 = vpow2.f32 %v851_v56  ;;  %v1067_v56 = vsel %vm777_vm3, %v1062_v55, 0 }
 0x24e   : > { %v769_v58 = vpop.xlane.xlu2 %768 }
 0x24f   : > { %1827 = vrcp.f32 %v769_v58 }
 0x251   : > { %v1826_v59 = vpop.eup %1825 }
 0x252   : > { %v853_v60 = vsel %vm741_vm2, %v1826_v59, 0.0 }
 0x253   : > { %854 = vadd.xlane.f32.xlu2 %v853_v60 }
 0x255   : > { %v1828_v61 = vpop.eup %1827 }
 0x256   : > { %v771_v62 = vmul.f32 %v1828_v61, %v1824_v43 }
 0x258   : > { %v773_v0 = vpack.c.bf16 %v771_v62, %v771_v62  ;;  %772 = vst.msk [vmem:[%s2453_s19] sm:$0xff] %vm741_vm2, %v771_v62 }
 0x25a   : > { %1599 = vmatmul.msk.bf16.vlgmr.msrb.gmra.mxu0 %vm741_vm2, %v773_v0 }
 0x25b   : > { %1017 = vmatpush.bf16.xpose.msrb.mxu0 %v1008_v1 }
 0x25e   : > { %v915_v2 = vpop.permute.xlu1 %914 }
 0x25f   : > { %v920_v3 = vsel %vm741_vm2, %v915_v2, 0 }
 0x260   : > { %929 = vmatpush.bf16.xpose.msra.mxu1 %v920_v3 }
 0x26b   : > { %909 = vrot.lane.b32.xlu2 %v2432_v24, %s2198_s5 }
 0x2c6   : > { %v855_v6 = vpop.xlane.xlu2 %854 }
 0x2c7   : > { %1829 = vrcp.f32 %v855_v6 }
 0x2cd   : > { %v1830_v7 = vpop.eup %1829 }
 0x2ce   : > { %v857_v8 = vmul.f32 %v1830_v7, %v1826_v59  ;;  %v910_v13 = vpop.permute.xlu2 %909 }
 0x2d0   : > { %v860_v9 = vpack.c.bf16 %v857_v8, %v857_v8  ;;  %1602 = vst.msk [vmem:[%s2453_s19 + $0x8] sm:$0xff] %vm741_vm2, %v857_v8 }
 0x2d2   : > { %1603 = vmatmul.msk.bf16.vlgmr.msrb.gmra.mxu3 %vm741_vm2, %v860_v9 }
 0x2d7   : > { %v790_v10 = vpop.f32.mrf.mxu0 }
 0x2d8   : > { %v794_v11 = vpack.c.bf16 %v790_v10, %v790_v10 }
 0x2da   : > { %1600 = vmatmul.msk.bf16.vlgmr.msrb.gmra.mxu1 %vm741_vm2, %v794_v11  ;;  %v2199_v11 = vmov 32.0  }
 0x2df   : > { %v792_v12 = vpop.f32.mrf.mxu0 }
 0x2ea   : > { %1605 = vmatmul.msk.bf16.vlgmr.msra.gmra.mxu1 %vm741_vm2, %v910_v13 }
 0x355   : > { %v881_v14 = vpop.f32.mrf.mxu3 }
 0x356   : > { %v885_v15 = vpack.c.bf16 %v881_v14, %v881_v14 }
 0x357   : > { %v811_v16 = vpop.f32.mrf.mxu1 }
 0x358   : > { %1604 = vmatmul.msk.bf16.vlgmr.msra.gmra.mxu0 %vm741_vm2, %v885_v15  ;;  %v815_v23 = vadd.f32 %v811_v16, %v2421_v5  ;;  %v996_v5 = vld [vmem:[#allocation3] sm:$0xf] }
 0x359   : > { %v1038_v38 = vunpack.c.l.b16 %v996_v5 }
 0x35b   : > { %v1039_v39 = vpack.c.b16 %v1038_v38, %v1038_v38  ;;  %v1672_v38 = vld [vmem:[%s2595_s9 + $0x8] sm:$0xff] }
 0x35d   : > { %v883_v17 = vpop.f32.mrf.mxu3 }
 0x35f   : > { %v813_v18 = vpop.f32.mrf.mxu1 }
 0x367   : > { %v931_v20 = vpop.f32.mrf.mxu1 }
 0x368   : > { %1609 = vmatmul.msk.bf16.vlgmr.msrb.gmra.mxu0 %vm741_vm2, %v998_v19  ;;  %v935_v21 = vsel %vm741_vm2, %v931_v20, -inf }
 0x369   : > { %936 = vmax.xlane.f32.xlu0 %v935_v21 }
 0x36f   : > { %v933_v22 = vpop.f32.mrf.mxu1 }
 0x3d5   : > { %v902_v24 = vpop.f32.mrf.mxu0 }
 0x3d6   : > { %v2472_v25 = vadd.f32 %v902_v24, %v815_v23  ;;  %v1670_v23 = vld [vmem:[#allocation15 + $0x8] sm:$0xff]  ;;  %v1669_v24 = vld [vmem:[#allocation15] sm:$0xff] }
 0x3d7   : > { %1164 = vmatpush.bf16.msrb.mxu3 %v1670_v23 }
 0x3db   : > { %1165 = vmatpush.bf16.msrb.mxu3 %v1669_v24 }
 0x3dc   : > { %v937_v26 = vpop.xlane.xlu0 %936 }
 0x3dd   : > { %v904_v27 = vpop.f32.mrf.mxu0  ;;  %v938_v28 = vsub.f32 %v931_v20, %v937_v26 }
 0x3df   : > { %v939_v29 = vmul.f32 1.442695, %v938_v28 }
 0x3e1   : > { %1831 = vpow2.f32 %v939_v29 }
 0x3e5   : > { %v1019_v30 = vpop.f32.mrf.mxu0 }
 0x3e6   : > { %v1023_v31 = vsel %vm741_vm2, %v1019_v30, -inf }
 0x3e7   : > { %1024 = vmax.xlane.f32.xlu2 %v1023_v31  ;;  %v1832_v32 = vpop.eup %1831 }
 0x3e8   : > { %v941_v33 = vsel %vm741_vm2, %v1832_v32, 0.0 }
 0x3e9   : > { %942 = vadd.xlane.f32.xlu1 %v941_v33 }
 0x3ed   : > { %v1021_v34 = vpop.f32.mrf.mxu0 }
 0x3ee   : > { %v1673_v34 = vld [vmem:[%s2595_s9 + $0x10] sm:$0xff] }
 0x3ff   : > { %952 = vrot.lane.b32.xlu2 %v951_v37, %s2198_s5 }
 0x402   : > { %1040 = vrot.lane.b32.xlu1 %v1039_v39, %s2197_s26 }
 0x45a   : > { %v1025_v40 = vpop.xlane.xlu2 %1024 }
 0x45b   : > { %v1026_v41 = vsub.f32 %v1019_v30, %v1025_v40 }
 0x45c   : > { %v943_v43 = vpop.xlane.xlu1 %942 }
 0x45d   : > { %v1027_v42 = vmul.f32 1.442695, %v1026_v41  ;;  %1833 = vrcp.f32 %v943_v43 }
 0x45f   : > { %1835 = vpow2.f32 %v1027_v42 }
 0x462   : > { %v953_v44 = vpop.permute.xlu2 %952 }
 0x463   : > { %v958_v45 = vsel %vm777_vm3, %v953_v44, 0  ;;  %v1834_v46 = vpop.eup %1833  ;;  %v1819_v44 = vld [vmem:[#allocation12] ss:$0 sm:$0xff] }
 0x464   : > { %967 = vmatpush.bf16.msra.mxu2 %v958_v45  ;;  %v945_v48 = vmul.f32 %v1834_v46, %v1832_v32  ;;  %v1674_v32 = vld [vmem:[%s2595_s9 + $0x18] sm:$0xff] }
 0x465   : > { %v1836_v47 = vpop.eup %1835  ;;  %1213 = vmatpush.bf16.msra.mxu0 %v1674_v32 }
 0x466   : > { %v1029_v49 = vsel %vm741_vm2, %v1836_v47, 0.0  ;;  %v948_v50 = vpack.c.bf16 %v945_v48, %v945_v48  ;;  %1606 = vst.msk [vmem:[%s2453_s19 + $0x10] sm:$0xff] %vm741_vm2, %v945_v48 }
 0x467   : > { %1030 = vadd.xlane.f32.xlu0 %v1029_v49 }
 0x468   : > { %1607 = vmatmul.msk.bf16.vlgmr.msra.gmra.mxu2 %vm741_vm2, %v948_v50 }
 0x469   : > { %1076 = vmatpush.bf16.msrb.mxu2 %v1067_v56  ;;  %1214 = vmatpush.bf16.msra.mxu0 %v1673_v34  ;;  %v1671_v56 = vld [vmem:[%s2595_s9] sm:$0xff] }
 0x46d   : > { %1215 = vmatpush.bf16.msra.mxu0 %v1672_v38 }
 0x471   : > { %1216 = vmatpush.bf16.msra.mxu0 %v1671_v56 }
 0x474   : > { %v1041_v51 = vpop.permute.xlu1 %1040 }
 0x475   : > { %v1046_v52 = vsel %vm777_vm3, %v1041_v51, 0  ;;  %v1820_v51 = vld [vmem:[#allocation13] ss:$0 sm:$0xff] }
 0x476   : > { %1055 = vmatpush.bf16.msrb.mxu1 %v1046_v52 }
 0x4da   : > { %v1031_v57 = vpop.xlane.xlu0 %1030 }
 0x4db   : > { %1837 = vrcp.f32 %v1031_v57  ;;  %v1678_v57 = vld [vmem:[%s2596_s10 + $0x18] sm:$0xff] }
 0x4dc   : > { %1839 = vrcp.f32 %v2199_v11  ;;  %1263 = vmatpush.bf16.msra.mxu1 %v1678_v57 }
 0x4e1   : > { %v1838_v58 = vpop.eup %1837 }
 0x4e2   : > { %v1033_v59 = vmul.f32 %v1838_v58, %v1836_v47  ;;  %v1840_v12 = vpop.eup %1839  ;;  %v1677_v58 = vld [vmem:[%s2596_s10 + $0x10] sm:$0xff] }
 0x4e3   : > { %v1089_v13 = vmul.f32 32.0, %v1840_v12  ;;  %vm1093_vm4 = vweird.f32 %v1840_v12  ;;  %1264 = vmatpush.bf16.msra.mxu1 %v1677_v58 }
 0x4e4   : > { %v1036_v60 = vpack.c.bf16 %v1033_v59, %v1033_v59  ;;  %1610 = vst.msk [vmem:[%s2453_s19 + $0x18] sm:$0xff] %vm741_vm2, %v1033_v59  ;;  %v1676_v59 = vld [vmem:[%s2596_s10 + $0x8] sm:$0xff] }
 0x4e5   : > { %v1090_v14 = vsub.f32 1.0, %v1089_v13 }
 0x4e6   : > { %1611 = vmatmul.msk.bf16.vlgmr.msrb.gmra.mxu1 %vm741_vm2, %v1036_v60 }
 0x4e7   : > { %v1091_v15 = vmul.f32 %v1840_v12, %v1090_v14  ;;  %1265 = vmatpush.bf16.msra.mxu1 %v1676_v59 }
 0x4e9   : > { %v1092_v16 = vadd.f32 %v1840_v12, %v1091_v15 }
 0x4eb   : > { %v969_v61 = vpop.f32.mrf.mxu2  ;;  %v2493_v17 = vsel %vm1093_vm4, %v1840_v12, %v1092_v16 }
 0x4ec   : > { %v973_v62 = vpack.c.bf16 %v969_v61, %v969_v61 }
 0x4ee   : > { %1608 = vmatmul.msk.bf16.vlgmr.msra.gmra.mxu3 %vm741_vm2, %v973_v62 }
 0x4f3   : > { %v971_v63 = vpop.f32.mrf.mxu2 }
 0x563   : > { %v1057_v0 = vpop.f32.mrf.mxu1 }
 0x564   : > { %v1061_v1 = vpack.c.bf16 %v1057_v0, %v1057_v0  ;;  %v1675_v0 = vld [vmem:[%s2596_s10] sm:$0xff] }
 0x565   : > { %1266 = vmatpush.bf16.msra.mxu1 %v1675_v0 }
 0x566   : > { %1612 = vmatmul.msk.bf16.vlgmr.msrb.gmra.mxu2 %vm741_vm2, %v1061_v1 }
 0x56b   : > { %v1059_v2 = vpop.f32.mrf.mxu1 }
 0x571   : > { %v990_v3 = vpop.f32.mrf.mxu3 }
 0x572   : > { %v994_v4 = vadd.f32 %v990_v3, %v2472_v25 }
 0x579   : > { %v992_v6 = vpop.f32.mrf.mxu3 }
 0x5e9   : > { %v1078_v7 = vpop.f32.mrf.mxu2 }
 0x5ea   : > { %v1082_v8 = vadd.f32 %v1078_v7, %v994_v4 }
 0x5ec   : > { %v1085_v9 = vsel %vm652_vm0, %v1082_v8, 0.0 }
 0x5ed   : > { %1086 = vadd.xlane.f32.xlu0 %v1085_v9 }
 0x5f1   : > { %v1080_v10 = vpop.f32.mrf.mxu2 }
 0x660   : > { %v1087_v18 = vpop.xlane.xlu0 %1086 }
 0x661   : > { %v1095_v19 = vmul.f32 %v2493_v17, %v1087_v18 }
 0x663   : > { %v1096_v20 = vsub.f32 %v1082_v8, %v1095_v19 }
 0x665   : > { %v1097_v21 = vmul.f32 %v1096_v20, %v1096_v20  ;;  %v1105_v49 = vmul.f32 %v1819_v44, %v1096_v20 }
 0x667   : > { %v1098_v22 = vsel %vm652_vm0, %v1097_v21, 0.0 }
 0x668   : > { %1099 = vadd.xlane.f32.xlu0 %v1098_v22 }
 0x6db   : > { %v1100_v25 = vpop.xlane.xlu0 %1099 }
 0x6dc   : > { %v1101_v26 = vmul.f32 0.032258064, %v1100_v25 }
 0x6de   : > { %1841 = vrsqrt.f32 %v1101_v26  ;;  %vm1113_vm5 = vcmp.eq.f32.partialorder %v1101_v26, inf  ;;  %v1116_v36 = vand.u32 2147483648, %v1101_v26  ;;  %vm1115_vm6 = vcmp.eq.f32.partialorder %v1101_v26, 0.0 }
 0x6e4   : > { %v1842_v27 = vpop.eup %1841 }
 0x6e5   : > { %v1107_v28 = vmul.f32 %v1842_v27, %v1101_v26 }
 0x6e7   : > { %v1108_v29 = vmul.f32 %v1842_v27, %v1107_v28 }
 0x6e9   : > { %v1109_v30 = vmul.f32 0.5, %v1108_v29 }
 0x6eb   : > { %v1110_v31 = vsub.f32 1.5, %v1109_v30 }
 0x6ed   : > { %v1111_v33 = vmul.f32 %v1842_v27, %v1110_v31 }
 0x6ef   : > { %v1112_v35 = vmul.f32 %v1111_v33, %v1101_v26 }
 0x6f1   : > { %v1114_v5 = vsel %vm1113_vm5, %v1101_v26, %v1112_v35 }
 0x6f2   : > { %v1117_v37 = vsel %vm1115_vm6, %v1116_v36, %v1114_v5 }
 0x6f3   : > { %v1118_v39 = vadd.f32 1e-06, %v1117_v37 }
 0x6f5   : > { %1843 = vrcp.f32 %v1118_v39  ;;  %v1130_v43 = vand.u32 2147483648, %v1118_v39  ;;  %v1128_v46 = vand.u32 2147483647, %v1118_v39  ;;  %vm1124_vm8 = vweird.f32 %v1118_v39 }
 0x6f7   : > { %v1131_v48 = vor.u32 1.1754944e-38, %v1130_v43  ;;  %vm1129_vm10 = vcmp.eq.f32.partialorder %v1128_v46, 8.507059e+37 }
 0x6fb   : > { %v1844_v40 = vpop.eup %1843 }
 0x6fc   : > { %v1120_v41 = vmul.f32 %v1844_v40, %v1118_v39  ;;  %vm1125_vm7 = vweird.f32 %v1844_v40 }
 0x6fd   : > { %vm1126_vm9 = vmor %vm1124_vm8, %vm1125_vm7 }
 0x6fe   : > { %v1121_v42 = vsub.f32 1.0, %v1120_v41 }
 0x700   : > { %v1122_v45 = vmul.f32 %v1844_v40, %v1121_v42 }
 0x702   : > { %v1123_v47 = vadd.f32 %v1844_v40, %v1122_v45 }
 0x704   : > { %v1127_v50 = vsel %vm1126_vm9, %v1844_v40, %v1123_v47 }
 0x705   : > { %v1132_v52 = vsel %vm1129_vm10, %v1131_v48, %v1127_v50 }
 0x706   : > { %v1133_v53 = vmul.f32 %v1132_v52, %v1105_v49 }
 0x708   : > { %v1137_v54 = vadd.f32 %v1820_v51, %v1133_v53 }
 0x70a   : > { %v1138_v55 = vpack.c.bf16 %v1137_v54, %v1137_v54 }
 0x70c   : > { %1621 = vmatmul.msk.bf16.vlgmr.msrb.gmra.mxu3 %vm652_vm0, %v1138_v55 }
 0x78f   : > { %v1167_v60 = vpop.f32.mrf.mxu3 }
 0x790   : > { %v1171_v61 = vmax.f32 %v1167_v60, 0.0 }
 0x792   : > { %v1172_v62 = vpack.c.bf16 %v1171_v61, %v1171_v61 }
 0x794   : > { %1638 = vmatmul.msk.bf16.vlgmr.msra.gmra.mxu0 %vm1205_vm11, %v1172_v62 }
 0x797   : > { %v1169_v63 = vpop.f32.mrf.mxu3 }
 0x811   : > { %v1218_v1 = vpop.f32.mrf.mxu0 }
 0x812   : > { %v1222_v2 = vmax.f32 %v1218_v1, 0.0 }
 0x814   : > { %v1223_v3 = vpack.c.bf16 %v1222_v2, %v1222_v2 }
 0x816   : > { %1655 = vmatmul.msk.bf16.vlgmr.msra.gmra.mxu1 %vm1205_vm11, %v1223_v3 }
 0x819   : > { %v1220_v4 = vpop.f32.mrf.mxu0 }
 0x893   : > { %v1268_v6 = vpop.f32.mrf.mxu1 }
 0x894   : > { %v1269_v7 = vadd.f32 %v1268_v6, %v1137_v54 }
 0x896   : > { %v1274_v8 = vsel %vm652_vm0, %v1269_v7, 0.0 }
 0x897   : > { %1275 = vadd.xlane.f32.xlu2 %v1274_v8 }
 0x89b   : > { %v1270_v9 = vpop.f32.mrf.mxu1 }
 0x90a   : > { %v1276_v10 = vpop.xlane.xlu2 %1275 }
 0x90b   : > { %v1277_v11 = vmul.f32 %v1276_v10, %v2493_v17 }
 0x90d   : > { %v1278_v12 = vsub.f32 %v1269_v7, %v1277_v11 }
 0x90f   : > { %v1279_v13 = vmul.f32 %v1278_v12, %v1278_v12 }
 0x911   : > { %v1280_v14 = vsel %vm652_vm0, %v1279_v13, 0.0 }
 0x912   : > { %1281 = vadd.xlane.f32.xlu0 %v1280_v14 }
 0x913   : > { %2086 = shalt.err (!%p2083_p9)
}
 0x914   : > { %s2200_s19 = smov 128   ;;  %s2201_s5 = smov 8   ;;  %v1821_v32 = vld [vmem:[%s2597_s11] ss:$0 sm:$0xff] }
 0x915   : > { %1709 = dma.vmem_to_hbm [thread:$0]  (%p2317_p4), %s1356_s29, 512, %s1358_s27, %s1327_s22, %s2200_s19, %s2200_s19, %s2201_s5   ;;  %v1287_v5 = vmul.f32 %v1821_v32, %v1278_v12 }
 0x916   : > { %s1567_s21 = sshll.u32 %s2449_s7, 3  ;;  %s1658_s3 = sshll.u32 %s2177_s16, 3 }
 0x917   : > { %s2629_s27 = sld [smem:[#allocation36_spill]]  ;;  %s611_s28 = scalar_lea.vmem [#allocation16], %s1567_s21 }
 0x918   : > { %s2630_s12 = sld [smem:[#allocation35_spill]]  ;;  %s1340_s18 = sshll.u32 %s611_s28, 4  ;;  %s1341_s18 = int_to_ptr.vmem [resolvable:$true] %s1340_s18 }
 0x919   : > { %s1322_s15 = scalar_lea.sflag [#allocation6], %s2449_s7 }
 0x91d   : > { %s1338_s22 = scalar_lea.hbm %s2629_s27, %s1658_s3  ;;  %s2107_s21 = scalar_lea.hbm %s2629_s27, 16 }
 0x91e   : > { %v1822_v38 = vld [vmem:[%s2630_s12] ss:$0 sm:$0xff]  ;;  %s1342_s25 = sshll.u32 %s1338_s22, 4  ;;  %s1343_s25 = int_to_ptr.hbm [resolvable:$true] %s1342_s25 }
 0x91f   : > { %s2101_s26 = sshra.s32 %s1343_s25, 4  ;;  %s2102_s26 = int_to_ptr.hbm [resolvable:$true] %s2101_s26 }
 0x920   : > { %s2103_s19 = scalar_lea.hbm %s2102_s26, 8  ;;  %p2108_p13 = scmp.lt.s32.totalorder %s2102_s26, %s2629_s27 }
 0x921   : > { %p2104_p10 = scmp.ne.s32.totalorder %s2102_s26, %s2103_s19  ;;  %p2109_p0 = scmp.lt.s32.totalorder %s2107_s21, %s2103_s19 }
 0x923   : > { %p2105_p11 = pnand %p2104_p10, %p2317_p4  ;;  %p2110_p1 = por %p2109_p0, %p2108_p13 }
 0x925   : > { %p2106_p12 = pneg %p2105_p11 }
 0x927   : > { %p2111_p2 = pnand %p2110_p1, %p2106_p12 }
 0x985   : > { %v1282_v15 = vpop.xlane.xlu0 %1281 }
 0x986   : > { %v1283_v16 = vmul.f32 0.032258064, %v1282_v15 }
 0x988   : > { %1845 = vrsqrt.f32 %v1283_v16  ;;  %vm1295_vm12 = vcmp.eq.f32.partialorder %v1283_v16, inf  ;;  %v1298_v24 = vand.u32 2147483648, %v1283_v16  ;;  %vm1297_vm13 = vcmp.eq.f32.partialorder %v1283_v16, 0.0 }
 0x98e   : > { %v1846_v17 = vpop.eup %1845 }
 0x98f   : > { %v1289_v18 = vmul.f32 %v1846_v17, %v1283_v16 }
 0x991   : > { %v1290_v19 = vmul.f32 %v1846_v17, %v1289_v18 }
 0x993   : > { %v1291_v20 = vmul.f32 0.5, %v1290_v19 }
 0x995   : > { %v1292_v21 = vsub.f32 1.5, %v1291_v20 }
 0x997   : > { %v1293_v22 = vmul.f32 %v1846_v17, %v1292_v21 }
 0x999   : > { %v1294_v23 = vmul.f32 %v1293_v22, %v1283_v16 }
 0x99b   : > { %v1296_v25 = vsel %vm1295_vm12, %v1283_v16, %v1294_v23 }
 0x99c   : > { %v1299_v26 = vsel %vm1297_vm13, %v1298_v24, %v1296_v25 }
 0x99d   : > { %v1300_v27 = vadd.f32 1e-06, %v1299_v26 }
 0x99f   : > { %1847 = vrcp.f32 %v1300_v27  ;;  %v1312_v31 = vand.u32 2147483648, %v1300_v27  ;;  %v1310_v34 = vand.u32 2147483647, %v1300_v27  ;;  %vm1306_vm15 = vweird.f32 %v1300_v27 }
 0x9a1   : > { %v1313_v36 = vor.u32 1.1754944e-38, %v1312_v31  ;;  %vm1311_vm2 = vcmp.eq.f32.partialorder %v1310_v34, 8.507059e+37 }
 0x9a5   : > { %v1848_v28 = vpop.eup %1847 }
 0x9a6   : > { %v1302_v29 = vmul.f32 %v1848_v28, %v1300_v27  ;;  %vm1307_vm14 = vweird.f32 %v1848_v28 }
 0x9a7   : > { %vm1308_vm1 = vmor %vm1306_vm15, %vm1307_vm14 }
 0x9a8   : > { %v1303_v30 = vsub.f32 1.0, %v1302_v29 }
 0x9aa   : > { %v1304_v33 = vmul.f32 %v1848_v28, %v1303_v30 }
 0x9ac   : > { %v1305_v35 = vadd.f32 %v1848_v28, %v1304_v33 }
 0x9ae   : > { %v1309_v37 = vsel %vm1308_vm1, %v1848_v28, %v1305_v35 }
 0x9af   : > { %v1314_v39 = vsel %vm1311_vm2, %v1313_v36, %v1309_v37 }
 0x9b0   : > { %v1315_v40 = vmul.f32 %v1314_v39, %v1287_v5 }
 0x9b2   : > { %v1319_v41 = vadd.f32 %v1822_v38, %v1315_v40 }
 0x9b4   : > { %1320 = vst.msk [vmem:[%s611_s28] sm:$0xff] %vm652_vm0, %v1319_v41 }
 0x9b5   : > { %2114 = shalt.err (!%p2111_p2)
}
 0x9b6   : > { %1708 = dma.vmem_to_hbm [thread:$0]  (%p2317_p4), %s1341_s18, 128, %s1343_s25, %s1322_s15  }
 0x9b7 PF: > { %s2631_s7 = sld [smem:[#allocation28_spill]] }
 0x9b8   : > { %s2632_s13 = sld [smem:[#allocation25_spill]] }
 0x9bd   : > { %p1755_p3 = scmp.ge.s32.totalorder %s2631_s7, 2 }
 0x9be   : > { %s1372_s22 = sand.u32 1, %s2632_s13  }
 0x9bf   : > { %p1735_p5 = pnand %p1755_p3, %p2324_p8  ;;  %s1373_s16 = scalar_lea.sflag [#allocation6], %s1372_s22 }
 0x9c1   : > { %p1736_p6 = pneg %p1735_p5 }
 0x9c3   : > { %2156 = dma.done.wait (%p1736_p6), %s1373_s16, 128  }
 0x9c4   : > { %2158 = vsyncadd (%p1736_p6), %s1373_s16, 4294967168  ;;  %s1383_s20 = scalar_lea.sflag [#allocation18], %s1372_s22 }
 0x9c5   : > { %2160 = dma.done.wait (%p1736_p6), %s1383_s20, 512  }
 0x9c6   : > { %2162 = vsyncadd (%p1736_p6), %s1383_s20, 4294966784  ;;  %s35_s18 = sadd.s32 1, %s2631_s7   ;;  %s2634_s23 = sld [smem:[#allocation26_spill]] }
 0x9c7   : > { %p32_p7 = scmp.ge.s32.totalorder %s35_s18, 4   ;;  %s2635_s15 = sld [smem:[#allocation31_spill]] }
 0x9c8   : > { %s2636_s16 = sld [smem:[#allocation27_spill]]  ;;  %s2638_s29 = smov %s2169_s30 }
 0x9c9   : > { %s2637_s17 = sld [smem:[#allocation29_spill]]  ;;  %34 = sbr.rel (!%p32_p7) target bundleno = 16 (0x10), region = 163 }
 0x9cc   : > { %s2639_s30 = smov %s2634_s23 }
 0x9ce   :  { %1389 = vsyncpa [#allocation5], 1 }
 0x9cf   :  { %1391 = vsyncpa [#allocation5 + $0x1], 1 }
 0x9d0   :  { %1392 = vsyncpa [#allocation8], 1 }
 0x9d1   :  { %1393 = vsyncpa [#allocation11], 1 }
 0x9d2   :  { %1394 = vsyncpa [#allocation14], 1 }
 0x9d3   :  { %1395 = vsyncpa [#allocation6], 1 }
 0x9d4   :  { %1397 = vsyncpa [#allocation6 + $0x1], 1 }
 0x9d5   :  { %1398 = vsyncpa [#allocation18], 1 }
 0x9d6   :  { %1400 = vsyncpa [#allocation18 + $0x1], 1 }

</bundles_post_ra>
